<compile_context>
chip_gen: v7x
topology: tpu7x:2x2x1
jax: 0.10.0
libtpu: 0.0.40
codegen_flags: <defaults>
</compile_context>

<pallas_src>
import functools

import jax
import jax.numpy as jnp
from jax.experimental import pallas as pl
from jax.experimental.pallas import tpu as pltpu


def _leaky(v):
    return jnp.where(v > 0, v, 0.01 * v)


# ----------------------------- kernel -------------------------------------


def ramannet_kernel(x_ref, w1_ref, b1_ref, w2_ref, b2_ref, w3_ref, b3_ref,
                    emb_ref, top_ref, *, n_groups, kg):
    # x_ref : (bt, n_groups*kg) bf16         w1_ref: (n_groups, kg, fg) bf16
    # b1_ref: (1, n_groups*fg)  f32          w2_ref: (n_groups*fg, 512) bf16
    # w3_ref: (512, 256) bf16                biases f32; accumulation f32.

    # Stage 1: grouped block-diagonal per-window Linears (+ folded BN),
    # one lane-dense MXU matmul per group (static unrolled loop).
    parts = []
    for gi in range(n_groups):
        xg = x_ref[:, gi * kg:(gi + 1) * kg]
        parts.append(jnp.dot(xg, w1_ref[gi],
                             preferred_element_type=jnp.float32))
    h1 = parts[0] if n_groups == 1 else jnp.concatenate(parts, axis=1)
    f1 = _leaky(h1 + b1_ref[...])            # padded lanes: leaky(0) == 0

    # Stage 2: top1 Linear(25*nw, 512) + folded BN. Dropout = identity (eval).
    h2 = jnp.dot(f1.astype(w2_ref.dtype), w2_ref[...],
                 preferred_element_type=jnp.float32) + b2_ref[...]
    g2 = _leaky(h2)

    # Stage 3: Linear(512, 256).
    top = jnp.dot(g2.astype(w3_ref.dtype), w3_ref[...],
                  preferred_element_type=jnp.float32) + b3_ref[...]

    # emb = top / ||top||_2; all-zero rows (0/0 -> NaN in torch) map to 0.
    ssq = jnp.sum(top * top, axis=1, keepdims=True)
    inv = jnp.where(ssq > 0, jax.lax.rsqrt(ssq), 0.0)
    emb = top * inv

    top_ref[...] = top.astype(top_ref.dtype)
    emb_ref[...] = emb.astype(emb_ref.dtype)


# --------------------------- host wrappers ---------------------------------


def fold_and_pad_params(p, w_len, n_windows, *, lane_align=256):
    """Fold inference-mode BN into the Linears and build grouped
    block-diagonal bf16 weights.  lane_align=256 targets the 2x256x256 MXU of
    v6e/v7x; use lane_align=128 on v5e."""
    H, E = p["w3"].shape
    g = max(1, min(n_windows, lane_align // 25))   # windows per group
    n_groups = -(-n_windows // g)                  # cdiv
    kg = g * w_len
    fg = lane_align                                # 25*g <= lane_align
    f_total = n_groups * fg

    w1f = p["w1"] * p["s1"]                         # (nw, w_len, 25)
    b1f = (p["b1"] * p["s1"] + p["t1"])[:, 0, :]    # (nw, 25)
    w2f = p["w2"].reshape(25 * n_windows, H) * p["s2"]

    w1g = jnp.zeros((n_groups, kg, fg), jnp.float32)
    b1g = jnp.zeros((1, f_total), jnp.float32)
    w2g = jnp.zeros((f_total, H), jnp.float32)
    for wi in range(n_windows):
        gi, j = divmod(wi, g)
        r0 = gi * fg + j * 25
        w1g = w1g.at[gi, j * w_len:(j + 1) * w_len, j * 25:(j + 1) * 25].set(w1f[wi])
        b1g = b1g.at[0, r0:r0 + 25].set(b1f[wi])
        w2g = w2g.at[r0:r0 + 25, :].set(w2f[wi * 25:(wi + 1) * 25])

    b2f = p["b2"] * p["s2"] + p["t2"]               # (1, 512)

    return dict(
        w1=w1g.astype(jnp.bfloat16), b1=b1g,
        w2=w2g.astype(jnp.bfloat16), b2=b2f,
        w3=p["w3"].astype(jnp.bfloat16), b3=p["b3"],
        meta=dict(n_windows=n_windows, w_len=w_len,
                  group=g, n_groups=n_groups, kg=kg, fg=fg))


def _nbytes(a):
    return a.size * a.dtype.itemsize


def _pick_batch_tile(B, b_tile):
    """Largest tile <= b_tile, but keep >= 2 grid steps when B allows so the
    'parallel' batch axis can shard across v7x's two TensorCores."""
    bt = min(b_tile, B)
    if pl.cdiv(B, bt) < 2 and B >= 32:
        bt = ((pl.cdiv(B, 2) + 15) // 16) * 16     # multiple of 16 (bf16 sublanes)
    return bt


def ramannet_preprocess(x, fp, *, b_tile=512):
    meta = fp["meta"]
    B = x.shape[0]
    nw, w_len = meta["n_windows"], meta["w_len"]
    g, n_groups, kg, fg = meta["group"], meta["n_groups"], meta["kg"], meta["fg"]
    H, E = fp["w3"].shape
    f_total = n_groups * fg
    k1 = n_groups * kg

    nw_pad = n_groups * g
    if nw_pad != nw:                                 # zero-pad partial last group
        x = jnp.pad(x, ((0, 0), (0, nw_pad - nw), (0, 0)))
    x_flat = x.reshape(B, k1).astype(jnp.bfloat16)

    bt = _pick_batch_tile(B, b_tile)
    grid = (pl.cdiv(B, bt),)

    # VMEM footprint: resident weights (single-buffered) + double-buffered
    # x/output tiles + f32 intermediates; +50% headroom, clamped to 16..32 MiB.
    bytes_w = sum(_nbytes(fp[k]) for k in ("w1", "b1", "w2", "b2", "w3", "b3"))
    bytes_io = 2 * bt * k1 * 2 + 2 * 2 * bt * E * 4
    bytes_mid = bt * (f_total + H + 2 * E) * 4
    vmem_limit = int(min(max(1.5 * (bytes_w + bytes_io + bytes_mid), 16 << 20),
                         32 << 20))

    cost = pl.CostEstimate(
        flops=2 * B * (n_groups * kg * fg + f_total * H + H * E),
        transcendentals=0,
        bytes_accessed=_nbytes(x_flat) + bytes_w + 2 * B * E * 4)

    kernel = functools.partial(ramannet_kernel, n_groups=n_groups, kg=kg)
    const2 = lambda i: (0, 0)
    const3 = lambda i: (0, 0, 0)

    def build(single_buffer_weights):
        pm = ({"pipeline_mode": pl.Buffered(1)} if single_buffer_weights else {})
        in_specs = [
            pl.BlockSpec((bt, k1), lambda i: (i, 0)),        # x tile (pipelined)
            pl.BlockSpec((n_groups, kg, fg), const3, **pm),  # W1 grouped block-diag
            pl.BlockSpec((1, f_total), const2, **pm),        # b1
            pl.BlockSpec((f_total, H), const2, **pm),        # W2 (BN folded)
            pl.BlockSpec((1, H), const2, **pm),              # b2
            pl.BlockSpec((H, E), const2, **pm),              # W3
            pl.BlockSpec((1, E), const2, **pm),              # b3
        ]
        out_specs = (pl.BlockSpec((bt, E), lambda i: (i, 0)),   # emb
                     pl.BlockSpec((bt, E), lambda i: (i, 0)))   # top
        return pl.pallas_call(
            kernel,
            out_shape=(jax.ShapeDtypeStruct((B, E), jnp.float32),
                       jax.ShapeDtypeStruct((B, E), jnp.float32)),
            grid=grid,
            in_specs=in_specs,
            out_specs=out_specs,
            compiler_params=pltpu.CompilerParams(
                dimension_semantics=("parallel",),
                vmem_limit_bytes=vmem_limit),
            cost_estimate=cost,
        )

    args = (x_flat, fp["w1"], fp["b1"], fp["w2"], fp["b2"], fp["w3"], fp["b3"])
    try:
        emb, top = build(True)(*args)
        jax.block_until_ready((emb, top))
    except Exception:
        # Fallback if this toolchain rejects single-buffered (Buffered(1))
        # resident inputs; default double-buffering is semantically identical.
        emb, top = build(False)(*args)
    return emb, top


# ----------------------- parameters & reference -----------------------------


def make_params(key, w_len, n_windows):
    ks = jax.random.split(key, 12)
    eps = 1e-5

    # per-window Linear(w_len, 25)
    w1 = jax.random.normal(ks[0], (n_windows, w_len, 25), jnp.float32) * 0.1
    b1 = jax.random.normal(ks[1], (n_windows, 1, 25), jnp.float32) * 0.1
    # per-window BatchNorm1d(25): fold (gamma, beta, mean, var) -> scale/shift
    g1 = 1.0 + 0.1 * jax.random.normal(ks[2], (n_windows, 1, 25), jnp.float32)
    be1 = 0.1 * jax.random.normal(ks[3], (n_windows, 1, 25), jnp.float32)
    m1 = 0.1 * jax.random.normal(ks[4], (n_windows, 1, 25), jnp.float32)
    v1 = 0.5 + jnp.abs(jax.random.normal(ks[5], (n_windows, 1, 25), jnp.float32))
    s1 = g1 / jnp.sqrt(v1 + eps)
    t1 = be1 - m1 * s1

    # top1: Linear(25*nw, 512) -> rows reshaped into per-window blocks
    w2_full = jax.random.normal(ks[6], (25 * n_windows, 512), jnp.float32) * 0.05
    w2 = w2_full.reshape(n_windows, 25, 512)
    b2 = 0.1 * jax.random.normal(ks[7], (1, 512), jnp.float32)
    # BatchNorm1d(512)
    g2 = 1.0 + 0.1 * jax.random.normal(ks[8], (1, 512), jnp.float32)
    be2 = 0.1 * jax.random.normal(ks[9], (1, 512), jnp.float32)
    m2 = 0.1 * jax.random.normal(ks[10], (1, 512), jnp.float32)
    v2 = 0.5 + jnp.abs(jax.random.normal(ks[11], (1, 512), jnp.float32))
    s2 = g2 / jnp.sqrt(v2 + eps)
    t2 = be2 - m2 * s2

    # Linear(512, 256)
    kw3, kb3 = jax.random.split(jax.random.fold_in(key, 123))
    w3 = jax.random.normal(kw3, (512, 256), jnp.float32) * 0.05
    b3 = 0.1 * jax.random.normal(kb3, (1, 256), jnp.float32)

    return dict(w1=w1, b1=b1, s1=s1, t1=t1,
                w2=w2, b2=b2, s2=s2, t2=t2,
                w3=w3, b3=b3)


def reference(x, p):
    """Pure-JAX f32 replica of the PyTorch forward (inference mode)."""
    n_windows = x.shape[1]
    feats = []
    for i in range(n_windows):
        hi = x[:, i, :] @ p["w1"][i] + p["b1"][i]
        a = hi * p["s1"][i] + p["t1"][i]
        feats.append(jnp.where(a > 0, a, 0.01 * a))
    comb = jnp.concatenate(feats, axis=1)
    h2 = comb @ p["w2"].reshape(-1, 512) + p["b2"]
    a2 = h2 * p["s2"] + p["t2"]
    g2 = jnp.where(a2 > 0, a2, 0.01 * a2)
    top = g2 @ p["w3"] + p["b3"]
    emb = top / jnp.sqrt(jnp.sum(top * top, axis=1, keepdims=True))
    emb = jnp.where(jnp.isnan(emb), 0.0, emb)
    return emb, top


if __name__ == "__main__":
    B, n_windows, w_len = 8, 4, 16
    key = jax.random.PRNGKey(0)
    kx, kp = jax.random.split(key)
    x = jax.random.normal(kx, (B, n_windows, w_len), jnp.float32)
    params = make_params(kp, w_len, n_windows)
    folded = fold_and_pad_params(params, w_len, n_windows)   # lane_align=256 (v6e/v7x)

    emb, top = ramannet_preprocess(x, folded)
    jax.block_until_ready((emb, top))

    emb_ref, top_ref = reference(x, params)
    # bf16 matmul operands with f32 accumulation -> loosened tolerances vs f32 ref.
    assert jnp.allclose(top, top_ref, atol=6e-2, rtol=6e-2)
    assert jnp.allclose(emb, emb_ref, atol=3e-2, rtol=6e-2)
    print("KERNEL_OK")
</pallas_src>

<mosaic_0001>
module attributes {stable_mosaic.version = 11 : i64} {
  func.func @ramannet_kernel(%arg0: i32, %arg1: memref<8x64xbf16, #tpu.memory_space<vmem>>, %arg2: memref<1x64x256xbf16, #tpu.memory_space<vmem>>, %arg3: memref<1x256xf32, #tpu.memory_space<vmem>>, %arg4: memref<256x512xbf16, #tpu.memory_space<vmem>>, %arg5: memref<1x512xf32, #tpu.memory_space<vmem>>, %arg6: memref<512x256xbf16, #tpu.memory_space<vmem>>, %arg7: memref<1x256xf32, #tpu.memory_space<vmem>>, %arg8: memref<8x256xf32, #tpu.memory_space<vmem>>, %arg9: memref<8x256xf32, #tpu.memory_space<vmem>>) attributes {dimension_semantics = [#tpu.dimension_semantics<parallel>], iteration_bounds = array<i64: 1>, scalar_prefetch = 0 : i64, scratch_operands = 0 : i64, tpu.core_type = #tpu.core_type<tc>, window_params = [{transform_indices = @transform_0, window_bounds = array<i64: 8, 64>}, {pipeline_mode = #tpu.pipeline_mode<synchronous>, transform_indices = @transform_1, window_bounds = array<i64: 1, 64, 256>}, {pipeline_mode = #tpu.pipeline_mode<synchronous>, transform_indices = @transform_2, window_bounds = array<i64: 1, 256>}, {pipeline_mode = #tpu.pipeline_mode<synchronous>, transform_indices = @transform_3, window_bounds = array<i64: 256, 512>}, {pipeline_mode = #tpu.pipeline_mode<synchronous>, transform_indices = @transform_4, window_bounds = array<i64: 1, 512>}, {pipeline_mode = #tpu.pipeline_mode<synchronous>, transform_indices = @transform_5, window_bounds = array<i64: 512, 256>}, {pipeline_mode = #tpu.pipeline_mode<synchronous>, transform_indices = @transform_6, window_bounds = array<i64: 1, 256>}, {transform_indices = @transform_7, window_bounds = array<i64: 8, 256>}, {transform_indices = @transform_8, window_bounds = array<i64: 8, 256>}]} {
    %c0 = arith.constant 0 : index
    %c0_0 = arith.constant 0 : index
    %0 = vector.load %arg1[%c0, %c0_0] : memref<8x64xbf16, #tpu.memory_space<vmem>>, vector<8x64xbf16>
    %c0_1 = arith.constant 0 : index
    %c0_2 = arith.constant 0 : index
    %c0_3 = arith.constant 0 : index
    %1 = vector.load %arg2[%c0_1, %c0_2, %c0_3] : memref<1x64x256xbf16, #tpu.memory_space<vmem>>, vector<1x64x256xbf16>
    %2 = vector.shape_cast %1 : vector<1x64x256xbf16> to vector<64x256xbf16>
    %cst = arith.constant dense<0.000000e+00> : vector<8x256xf32>
    %3 = tpu.matmul %0, %2, %cst {dimension_numbers = #tpu.dot_dimension_numbers<[1], [0], [0], [1], [0, 0, 1, 1], [], []>} : vector<8x64xbf16>, vector<64x256xbf16>, vector<8x256xf32> -> vector<8x256xf32>
    %c0_4 = arith.constant 0 : index
    %c0_5 = arith.constant 0 : index
    %4 = vector.load %arg3[%c0_4, %c0_5] : memref<1x256xf32, #tpu.memory_space<vmem>>, vector<1x256xf32>
    %5 = vector.broadcast %4 : vector<1x256xf32> to vector<8x256xf32>
    %6 = arith.addf %3, %5 : vector<8x256xf32>
    %cst_6 = arith.constant 0.000000e+00 : f32
    %7 = vector.broadcast %cst_6 : f32 to vector<8x256xf32>
    %8 = arith.cmpf ogt, %6, %7 : vector<8x256xf32>
    %cst_7 = arith.constant 0.00999999977 : f32
    %9 = vector.broadcast %cst_7 : f32 to vector<8x256xf32>
    %10 = arith.mulf %9, %6 : vector<8x256xf32>
    %11 = arith.select %8, %6, %10 : vector<8x256xi1>, vector<8x256xf32>
    %12 = arith.truncf %11 : vector<8x256xf32> to vector<8x256xbf16>
    %c0_8 = arith.constant 0 : index
    %c0_9 = arith.constant 0 : index
    %13 = vector.load %arg4[%c0_8, %c0_9] : memref<256x512xbf16, #tpu.memory_space<vmem>>, vector<256x512xbf16>
    %cst_10 = arith.constant dense<0.000000e+00> : vector<8x512xf32>
    %14 = tpu.matmul %12, %13, %cst_10 {dimension_numbers = #tpu.dot_dimension_numbers<[1], [0], [0], [1], [0, 0, 1, 1], [], []>} : vector<8x256xbf16>, vector<256x512xbf16>, vector<8x512xf32> -> vector<8x512xf32>
    %c0_11 = arith.constant 0 : index
    %c0_12 = arith.constant 0 : index
    %15 = vector.load %arg5[%c0_11, %c0_12] : memref<1x512xf32, #tpu.memory_space<vmem>>, vector<1x512xf32>
    %16 = vector.broadcast %15 : vector<1x512xf32> to vector<8x512xf32>
    %17 = arith.addf %14, %16 : vector<8x512xf32>
    %cst_13 = arith.constant 0.000000e+00 : f32
    %18 = vector.broadcast %cst_13 : f32 to vector<8x512xf32>
    %19 = arith.cmpf ogt, %17, %18 : vector<8x512xf32>
    %cst_14 = arith.constant 0.00999999977 : f32
    %20 = vector.broadcast %cst_14 : f32 to vector<8x512xf32>
    %21 = arith.mulf %20, %17 : vector<8x512xf32>
    %22 = arith.select %19, %17, %21 : vector<8x512xi1>, vector<8x512xf32>
    %23 = arith.truncf %22 : vector<8x512xf32> to vector<8x512xbf16>
    %c0_15 = arith.constant 0 : index
    %c0_16 = arith.constant 0 : index
    %24 = vector.load %arg6[%c0_15, %c0_16] : memref<512x256xbf16, #tpu.memory_space<vmem>>, vector<512x256xbf16>
    %cst_17 = arith.constant dense<0.000000e+00> : vector<8x256xf32>
    %25 = tpu.matmul %23, %24, %cst_17 {dimension_numbers = #tpu.dot_dimension_numbers<[1], [0], [0], [1], [0, 0, 1, 1], [], []>} : vector<8x512xbf16>, vector<512x256xbf16>, vector<8x256xf32> -> vector<8x256xf32>
    %c0_18 = arith.constant 0 : index
    %c0_19 = arith.constant 0 : index
    %26 = vector.load %arg7[%c0_18, %c0_19] : memref<1x256xf32, #tpu.memory_space<vmem>>, vector<1x256xf32>
    %27 = vector.broadcast %26 : vector<1x256xf32> to vector<8x256xf32>
    %28 = arith.addf %25, %27 : vector<8x256xf32>
    %29 = arith.mulf %28, %28 : vector<8x256xf32>
    %cst_20 = arith.constant dense<0.000000e+00> : vector<8xf32>
    %30 = vector.multi_reduction <add>, %29, %cst_20 [1] : vector<8x256xf32> to vector<8xf32>
    %31 = vector.shape_cast %30 : vector<8xf32> to vector<8x1xf32>
    %cst_21 = arith.constant 0.000000e+00 : f32
    %32 = vector.broadcast %cst_21 : f32 to vector<8x1xf32>
    %33 = arith.cmpf ogt, %31, %32 : vector<8x1xf32>
    %34 = math.rsqrt %31 : vector<8x1xf32>
    %cst_22 = arith.constant 0.000000e+00 : f32
    %35 = vector.broadcast %cst_22 : f32 to vector<8x1xf32>
    %36 = arith.select %33, %34, %35 : vector<8x1xi1>, vector<8x1xf32>
    %37 = vector.broadcast %36 : vector<8x1xf32> to vector<8x256xf32>
    %38 = arith.mulf %28, %37 : vector<8x256xf32>
    %c0_23 = arith.constant 0 : index
    %c0_24 = arith.constant 0 : index
    %39 = vector.load %arg9[%c0_23, %c0_24] : memref<8x256xf32, #tpu.memory_space<vmem>>, vector<8x256xf32>
    tpu.vector_store %arg9[%c0_23, %c0_24], %28 {strides = array<i32>} : memref<8x256xf32, #tpu.memory_space<vmem>>, vector<8x256xf32>,
    %c0_25 = arith.constant 0 : index
    %c0_26 = arith.constant 0 : index
    %40 = vector.load %arg8[%c0_25, %c0_26] : memref<8x256xf32, #tpu.memory_space<vmem>>, vector<8x256xf32>
    tpu.vector_store %arg8[%c0_25, %c0_26], %38 {strides = array<i32>} : memref<8x256xf32, #tpu.memory_space<vmem>>, vector<8x256xf32>,
    return
  }
  func.func @transform_0(%arg0: i32) -> (i32, i32) {
    %c0_i32 = arith.constant 0 : i32
    %c0_i32_0 = arith.constant 0 : i32
    return %arg0, %c0_i32 : i32, i32
  }
  func.func @transform_1(%arg0: i32) -> (i32, i32, i32) {
    %c0_i32 = arith.constant 0 : i32
    %c0_i32_0 = arith.constant 0 : i32
    %c0_i32_1 = arith.constant 0 : i32
    %c0_i32_2 = arith.constant 0 : i32
    return %c0_i32, %c0_i32_0, %c0_i32_1 : i32, i32, i32
  }
  func.func @transform_2(%arg0: i32) -> (i32, i32) {
    %c0_i32 = arith.constant 0 : i32
    %c0_i32_0 = arith.constant 0 : i32
    %c0_i32_1 = arith.constant 0 : i32
    return %c0_i32, %c0_i32_0 : i32, i32
  }
  func.func @transform_3(%arg0: i32) -> (i32, i32) {
    %c0_i32 = arith.constant 0 : i32
    %c0_i32_0 = arith.constant 0 : i32
    %c0_i32_1 = arith.constant 0 : i32
    return %c0_i32, %c0_i32_0 : i32, i32
  }
  func.func @transform_4(%arg0: i32) -> (i32, i32) {
    %c0_i32 = arith.constant 0 : i32
    %c0_i32_0 = arith.constant 0 : i32
    %c0_i32_1 = arith.constant 0 : i32
    return %c0_i32, %c0_i32_0 : i32, i32
  }
  func.func @transform_5(%arg0: i32) -> (i32, i32) {
    %c0_i32 = arith.constant 0 : i32
    %c0_i32_0 = arith.constant 0 : i32
    %c0_i32_1 = arith.constant 0 : i32
    return %c0_i32, %c0_i32_0 : i32, i32
  }
  func.func @transform_6(%arg0: i32) -> (i32, i32) {
    %c0_i32 = arith.constant 0 : i32
    %c0_i32_0 = arith.constant 0 : i32
    %c0_i32_1 = arith.constant 0 : i32
    return %c0_i32, %c0_i32_0 : i32, i32
  }
  func.func @transform_7(%arg0: i32) -> (i32, i32) {
    %c0_i32 = arith.constant 0 : i32
    %c0_i32_0 = arith.constant 0 : i32
    return %arg0, %c0_i32 : i32, i32
  }
  func.func @transform_8(%arg0: i32) -> (i32, i32) {
    %c0_i32 = arith.constant 0 : i32
    %c0_i32_0 = arith.constant 0 : i32
    return %arg0, %c0_i32 : i32, i32
  }
}

module attributes {stable_mosaic.version = 11 : i64} {
  func.func @ramannet_kernel(%arg0: i32, %arg1: memref<8x64xbf16, #tpu.memory_space<vmem>>, %arg2: memref<1x64x256xbf16, #tpu.memory_space<vmem>>, %arg3: memref<1x256xf32, #tpu.memory_space<vmem>>, %arg4: memref<256x512xbf16, #tpu.memory_space<vmem>>, %arg5: memref<1x512xf32, #tpu.memory_space<vmem>>, %arg6: memref<512x256xbf16, #tpu.memory_space<vmem>>, %arg7: memref<1x256xf32, #tpu.memory_space<vmem>>, %arg8: memref<8x256xf32, #tpu.memory_space<vmem>>, %arg9: memref<8x256xf32, #tpu.memory_space<vmem>>) attributes {dimension_semantics = [#tpu.dimension_semantics<parallel>], iteration_bounds = array<i64: 1>, scalar_prefetch = 0 : i64, scratch_operands = 0 : i64, tpu.core_type = #tpu.core_type<tc>, window_params = [{transform_indices = @transform_0, window_bounds = array<i64: 8, 64>}, {pipeline_mode = #tpu.pipeline_mode<synchronous>, transform_indices = @transform_1, window_bounds = array<i64: 1, 64, 256>}, {pipeline_mode = #tpu.pipeline_mode<synchronous>, transform_indices = @transform_2, window_bounds = array<i64: 1, 256>}, {pipeline_mode = #tpu.pipeline_mode<synchronous>, transform_indices = @transform_3, window_bounds = array<i64: 256, 512>}, {pipeline_mode = #tpu.pipeline_mode<synchronous>, transform_indices = @transform_4, window_bounds = array<i64: 1, 512>}, {pipeline_mode = #tpu.pipeline_mode<synchronous>, transform_indices = @transform_5, window_bounds = array<i64: 512, 256>}, {pipeline_mode = #tpu.pipeline_mode<synchronous>, transform_indices = @transform_6, window_bounds = array<i64: 1, 256>}, {transform_indices = @transform_7, window_bounds = array<i64: 8, 256>}, {transform_indices = @transform_8, window_bounds = array<i64: 8, 256>}]} {
    %c0 = arith.constant 0 : index
    %c0_0 = arith.constant 0 : index
    %0 = vector.load %arg1[%c0, %c0_0] : memref<8x64xbf16, #tpu.memory_space<vmem>>, vector<8x64xbf16>
    %c0_1 = arith.constant 0 : index
    %c0_2 = arith.constant 0 : index
    %c0_3 = arith.constant 0 : index
    %1 = vector.load %arg2[%c0_1, %c0_2, %c0_3] : memref<1x64x256xbf16, #tpu.memory_space<vmem>>, vector<1x64x256xbf16>
    %2 = vector.shape_cast %1 : vector<1x64x256xbf16> to vector<64x256xbf16>
    %cst = arith.constant dense<0.000000e+00> : vector<8x256xf32>
    %3 = tpu.matmul %0, %2, %cst {dimension_numbers = #tpu.dot_dimension_numbers<[1], [0], [0], [1], [0, 0, 1, 1], [], []>} : vector<8x64xbf16>, vector<64x256xbf16>, vector<8x256xf32> -> vector<8x256xf32>
    %c0_4 = arith.constant 0 : index
    %c0_5 = arith.constant 0 : index
    %4 = vector.load %arg3[%c0_4, %c0_5] : memref<1x256xf32, #tpu.memory_space<vmem>>, vector<1x256xf32>
    %5 = vector.broadcast %4 : vector<1x256xf32> to vector<8x256xf32>
    %6 = arith.addf %3, %5 : vector<8x256xf32>
    %cst_6 = arith.constant 0.000000e+00 : f32
    %7 = vector.broadcast %cst_6 : f32 to vector<8x256xf32>
    %8 = arith.cmpf ogt, %6, %7 : vector<8x256xf32>
    %cst_7 = arith.constant 0.00999999977 : f32
    %9 = vector.broadcast %cst_7 : f32 to vector<8x256xf32>
    %10 = arith.mulf %9, %6 : vector<8x256xf32>
    %11 = arith.select %8, %6, %10 : vector<8x256xi1>, vector<8x256xf32>
    %12 = arith.truncf %11 : vector<8x256xf32> to vector<8x256xbf16>
    %c0_8 = arith.constant 0 : index
    %c0_9 = arith.constant 0 : index
    %13 = vector.load %arg4[%c0_8, %c0_9] : memref<256x512xbf16, #tpu.memory_space<vmem>>, vector<256x512xbf16>
    %cst_10 = arith.constant dense<0.000000e+00> : vector<8x512xf32>
    %14 = tpu.matmul %12, %13, %cst_10 {dimension_numbers = #tpu.dot_dimension_numbers<[1], [0], [0], [1], [0, 0, 1, 1], [], []>} : vector<8x256xbf16>, vector<256x512xbf16>, vector<8x512xf32> -> vector<8x512xf32>
    %c0_11 = arith.constant 0 : index
    %c0_12 = arith.constant 0 : index
    %15 = vector.load %arg5[%c0_11, %c0_12] : memref<1x512xf32, #tpu.memory_space<vmem>>, vector<1x512xf32>
    %16 = vector.broadcast %15 : vector<1x512xf32> to vector<8x512xf32>
    %17 = arith.addf %14, %16 : vector<8x512xf32>
    %cst_13 = arith.constant 0.000000e+00 : f32
    %18 = vector.broadcast %cst_13 : f32 to vector<8x512xf32>
    %19 = arith.cmpf ogt, %17, %18 : vector<8x512xf32>
    %cst_14 = arith.constant 0.00999999977 : f32
    %20 = vector.broadcast %cst_14 : f32 to vector<8x512xf32>
    %21 = arith.mulf %20, %17 : vector<8x512xf32>
    %22 = arith.select %19, %17, %21 : vector<8x512xi1>, vector<8x512xf32>
    %23 = arith.truncf %22 : vector<8x512xf32> to vector<8x512xbf16>
    %c0_15 = arith.constant 0 : index
    %c0_16 = arith.constant 0 : index
    %24 = vector.load %arg6[%c0_15, %c0_16] : memref<512x256xbf16, #tpu.memory_space<vmem>>, vector<512x256xbf16>
    %cst_17 = arith.constant dense<0.000000e+00> : vector<8x256xf32>
    %25 = tpu.matmul %23, %24, %cst_17 {dimension_numbers = #tpu.dot_dimension_numbers<[1], [0], [0], [1], [0, 0, 1, 1], [], []>} : vector<8x512xbf16>, vector<512x256xbf16>, vector<8x256xf32> -> vector<8x256xf32>
    %c0_18 = arith.constant 0 : index
    %c0_19 = arith.constant 0 : index
    %26 = vector.load %arg7[%c0_18, %c0_19] : memref<1x256xf32, #tpu.memory_space<vmem>>, vector<1x256xf32>
    %27 = vector.broadcast %26 : vector<1x256xf32> to vector<8x256xf32>
    %28 = arith.addf %25, %27 : vector<8x256xf32>
    %29 = arith.mulf %28, %28 : vector<8x256xf32>
    %cst_20 = arith.constant dense<0.000000e+00> : vector<8xf32>
    %30 = vector.multi_reduction <add>, %29, %cst_20 [1] : vector<8x256xf32> to vector<8xf32>
    %31 = vector.shape_cast %30 : vector<8xf32> to vector<8x1xf32>
    %cst_21 = arith.constant 0.000000e+00 : f32
    %32 = vector.broadcast %cst_21 : f32 to vector<8x1xf32>
    %33 = arith.cmpf ogt, %31, %32 : vector<8x1xf32>
    %34 = math.rsqrt %31 : vector<8x1xf32>
    %cst_22 = arith.constant 0.000000e+00 : f32
    %35 = vector.broadcast %cst_22 : f32 to vector<8x1xf32>
    %36 = arith.select %33, %34, %35 : vector<8x1xi1>, vector<8x1xf32>
    %37 = vector.broadcast %36 : vector<8x1xf32> to vector<8x256xf32>
    %38 = arith.mulf %28, %37 : vector<8x256xf32>
    %c0_23 = arith.constant 0 : index
    %c0_24 = arith.constant 0 : index
    %39 = vector.load %arg9[%c0_23, %c0_24] : memref<8x256xf32, #tpu.memory_space<vmem>>, vector<8x256xf32>
    tpu.vector_store %arg9[%c0_23, %c0_24], %28 {strides = array<i32>} : memref<8x256xf32, #tpu.memory_space<vmem>>, vector<8x256xf32>,
    %c0_25 = arith.constant 0 : index
    %c0_26 = arith.constant 0 : index
    %40 = vector.load %arg8[%c0_25, %c0_26] : memref<8x256xf32, #tpu.memory_space<vmem>>, vector<8x256xf32>
    tpu.vector_store %arg8[%c0_25, %c0_26], %38 {strides = array<i32>} : memref<8x256xf32, #tpu.memory_space<vmem>>, vector<8x256xf32>,
    return
  }
  func.func @transform_0(%arg0: i32) -> (i32, i32) {
    %c0_i32 = arith.constant 0 : i32
    %c0_i32_0 = arith.constant 0 : i32
    return %arg0, %c0_i32 : i32, i32
  }
  func.func @transform_1(%arg0: i32) -> (i32, i32, i32) {
    %c0_i32 = arith.constant 0 : i32
    %c0_i32_0 = arith.constant 0 : i32
    %c0_i32_1 = arith.constant 0 : i32
    %c0_i32_2 = arith.constant 0 : i32
    return %c0_i32, %c0_i32_0, %c0_i32_1 : i32, i32, i32
  }
  func.func @transform_2(%arg0: i32) -> (i32, i32) {
    %c0_i32 = arith.constant 0 : i32
    %c0_i32_0 = arith.constant 0 : i32
    %c0_i32_1 = arith.constant 0 : i32
    return %c0_i32, %c0_i32_0 : i32, i32
  }
  func.func @transform_3(%arg0: i32) -> (i32, i32) {
    %c0_i32 = arith.constant 0 : i32
    %c0_i32_0 = arith.constant 0 : i32
    %c0_i32_1 = arith.constant 0 : i32
    return %c0_i32, %c0_i32_0 : i32, i32
  }
  func.func @transform_4(%arg0: i32) -> (i32, i32) {
    %c0_i32 = arith.constant 0 : i32
    %c0_i32_0 = arith.constant 0 : i32
    %c0_i32_1 = arith.constant 0 : i32
    return %c0_i32, %c0_i32_0 : i32, i32
  }
  func.func @transform_5(%arg0: i32) -> (i32, i32) {
    %c0_i32 = arith.constant 0 : i32
    %c0_i32_0 = arith.constant 0 : i32
    %c0_i32_1 = arith.constant 0 : i32
    return %c0_i32, %c0_i32_0 : i32, i32
  }
  func.func @transform_6(%arg0: i32) -> (i32, i32) {
    %c0_i32 = arith.constant 0 : i32
    %c0_i32_0 = arith.constant 0 : i32
    %c0_i32_1 = arith.constant 0 : i32
    return %c0_i32, %c0_i32_0 : i32, i32
  }
  func.func @transform_7(%arg0: i32) -> (i32, i32) {
    %c0_i32 = arith.constant 0 : i32
    %c0_i32_0 = arith.constant 0 : i32
    return %arg0, %c0_i32 : i32, i32
  }
  func.func @transform_8(%arg0: i32) -> (i32, i32) {
    %c0_i32 = arith.constant 0 : i32
    %c0_i32_0 = arith.constant 0 : i32
    return %arg0, %c0_i32 : i32, i32
  }
}

</mosaic_0001>

<bundles_post_ra>
// kernel: tpu_custom_call.1
= control target key start
LH: loop header
LB: loop body
LE: loop exit
PB: predicated region body
PF: predicated region fallthrough
CT: control target
= control target key end

     0   :  { %14 = vsyncpa [#allocation3], 0  ;;  %s1896_s0 = inlined_call_operand.hbm [shape: bf16[8,64], index: 0, kind: input, shape index: {}]   ;;  %s1897_s1 = inlined_call_operand.hbm [shape: bf16[1,64,256], index: 1, kind: input, shape index: {}]   ;;  %s1898_s2 = inlined_call_operand.vmem [shape: f32[1,256], index: 2, kind: input, shape index: {}]   ;;  %s1899_s3 = inlined_call_operand.hbm [shape: bf16[256,512], index: 3, kind: input, shape index: {}]   ;;  %s1900_s4 = inlined_call_operand.vmem [shape: f32[1,512], index: 4, kind: input, shape index: {}]   ;;  %s1901_s5 = inlined_call_operand.hbm [shape: bf16[512,256], index: 5, kind: input, shape index: {}]   ;;  %s1902_s6 = inlined_call_operand.vmem [shape: f32[1,256], index: 6, kind: input, shape index: {}]   ;;  %s1903_s7 = inlined_call_operand.hbm [shape: f32[8,256], index: 7, kind: output, shape index: {0}]   ;;  %s1904_s8 = inlined_call_operand.hbm [shape: f32[8,256], index: 8, kind: output, shape index: {1}]  }
   0x1   :  { %15 = vsyncpa [#allocation6], 0 }
   0x2   :  { %16 = vsyncpa [#allocation9], 0 }
   0x3   :  { %17 = vsyncpa [#allocation4], 0 }
   0x4   :  { %18 = vsyncpa [#allocation12], 0  ;;  %s1727_s27 = smov [#allocation5]   ;;  %s1585_s9 = scalar_lea.hbm %s1897_s1, 1024 }
   0x5   :  { %s34_s28 = sshll.u32 %s1727_s27, 4  ;;  %p1586_p0 = scmp.ne.s32.totalorder %s1897_s1, %s1585_s9  ;;  %s35_s28 = int_to_ptr.vmem [resolvable:$true] %s34_s28 }
   0x6   :  { %p1589_p1 = scmp.lt.u32.totalorder %s1585_s9, %s1897_s1 }
   0x8   :  { %p1591_p2 = pnand %p1589_p1, %p1586_p0 }
   0xa   :  { %1594 = shalt.err (!%p1591_p2)
}
   0xb   :  { %s1595_s14 = scalar_lea.vmem %s35_s28, 1024  ;;  %p1600_p4 = scmp.lt.s32.totalorder %s35_s28, %s35_s28 }
   0xc   :  { %p1596_p3 = scmp.ne.s32.totalorder %s35_s28, %s1595_s14  ;;  %p1601_p5 = scmp.lt.s32.totalorder %s1595_s14, %s1595_s14 }
   0xe   :  { %p1602_p6 = por %p1601_p5, %p1600_p4 }
  0x10   :  { %p1603_p7 = pnand %p1602_p6, %p1596_p3 }
  0x12   :  { %1606 = shalt.err (!%p1603_p7)
}
  0x13   :  { %s1728_s15 = smov 128   ;;  %s1729_s16 = smov 8  }
  0x14   :  { %40 = dma.hbm_to_vmem [thread:$0]  %s1897_s1, 1024, %s35_s28, [#allocation6], %s1728_s15, %s1728_s15, %s1729_s16  }
  0x15   :  { %s1730_s19 = smov [#allocation2]   ;;  %s1731_s21 = smov [#allocation7]  }
  0x16   :  { %s25_s20 = sshll.u32 %s1730_s19, 4  ;;  %s48_s22 = sshll.u32 %s1731_s21, 4  ;;  %s26_s20 = int_to_ptr.vmem [resolvable:$true] %s25_s20  ;;  %s49_s22 = int_to_ptr.vmem [resolvable:$true] %s48_s22 }
  0x17   :  { %s1607_s25 = scalar_lea.hbm %s1896_s0, 64 }
  0x18   :  { %p1608_p8 = scmp.ne.s32.totalorder %s1896_s0, %s1607_s25  ;;  %p1611_p9 = scmp.lt.u32.totalorder %s1607_s25, %s1896_s0 }
  0x1a   :  { %p1613_p10 = pnand %p1611_p9, %p1608_p8 }
  0x1c   :  { %1616 = shalt.err (!%p1613_p10)
}
  0x1d   :  { %s1617_s1 = scalar_lea.vmem %s26_s20, 64  ;;  %p1622_p12 = scmp.lt.s32.totalorder %s26_s20, %s26_s20 }
  0x1e   :  { %p1618_p11 = scmp.ne.s32.totalorder %s26_s20, %s1617_s1  ;;  %p1623_p13 = scmp.lt.s32.totalorder %s1617_s1, %s1617_s1 }
  0x20   :  { %p1624_p0 = por %p1623_p13, %p1622_p12 }
  0x22   :  { %p1625_p1 = pnand %p1624_p0, %p1618_p11 }
  0x24   :  { %1628 = shalt.err (!%p1625_p1)
}
  0x25   :  { %28 = dma.hbm_to_vmem [thread:$0]  %s1896_s0, 64, %s26_s20, [#allocation3]  }
  0x26   :  { %s1629_s12 = scalar_lea.hbm %s1899_s3, 8192 }
  0x27   :  { %p1630_p2 = scmp.ne.s32.totalorder %s1899_s3, %s1629_s12  ;;  %p1633_p3 = scmp.lt.u32.totalorder %s1629_s12, %s1899_s3 }
  0x29   :  { %p1635_p4 = pnand %p1633_p3, %p1630_p2 }
  0x2b   :  { %1638 = shalt.err (!%p1635_p4)
}
  0x2c   :  { %s1639_s19 = scalar_lea.vmem %s49_s22, 8192  ;;  %p1644_p6 = scmp.lt.s32.totalorder %s49_s22, %s49_s22 }
  0x2d   :  { %p1640_p5 = scmp.ne.s32.totalorder %s49_s22, %s1639_s19  ;;  %p1645_p7 = scmp.lt.s32.totalorder %s1639_s19, %s1639_s19 }
  0x2f   :  { %p1646_p8 = por %p1645_p7, %p1644_p6 }
  0x31   :  { %p1647_p9 = pnand %p1646_p8, %p1640_p5 }
  0x33   :  { %1650 = shalt.err (!%p1647_p9)
}
  0x34   :  { %s1732_s0 = smov 256   ;;  %s1733_s20 = smov 16  }
  0x35   :  { %54 = dma.hbm_to_vmem [thread:$0]  %s1899_s3, 8192, %s49_s22, [#allocation6], %s1732_s0, %s1732_s0, %s1733_s20  }
  0x36   :  { %s1734_s24 = smov [#allocation8]   ;;  %s1651_s29 = scalar_lea.hbm %s1901_s5, 8192 }
  0x37   :  { %s62_s25 = sshll.u32 %s1734_s24, 4  ;;  %p1652_p10 = scmp.ne.s32.totalorder %s1901_s5, %s1651_s29  ;;  %s63_s25 = int_to_ptr.vmem [resolvable:$true] %s62_s25 }
  0x38   :  { %p1655_p11 = scmp.lt.u32.totalorder %s1651_s29, %s1901_s5 }
  0x3a   :  { %p1657_p12 = pnand %p1655_p11, %p1652_p10 }
  0x3c   :  { %1660 = shalt.err (!%p1657_p12)
}
  0x3d   :  { %s1661_s10 = scalar_lea.vmem %s63_s25, 8192  ;;  %p1666_p0 = scmp.lt.s32.totalorder %s63_s25, %s63_s25 }
  0x3e   :  { %p1662_p13 = scmp.ne.s32.totalorder %s63_s25, %s1661_s10  ;;  %p1667_p1 = scmp.lt.s32.totalorder %s1661_s10, %s1661_s10 }
  0x40   :  { %p1668_p2 = por %p1667_p1, %p1666_p0 }
  0x42   :  { %p1669_p3 = pnand %p1668_p2, %p1662_p13 }
  0x44   :  { %1672 = shalt.err (!%p1669_p3)
}
  0x45   :  { %68 = dma.hbm_to_vmem [thread:$0]  %s1901_s5, 8192, %s63_s25, [#allocation9], %s1728_s15, %s1728_s15, %s1729_s16  }
  0x46   :  { %1717 = dma.done.wait [#allocation3], 64  }
  0x47   :  { %1718 = vsyncadd [#allocation3], 4294967232 }
  0x48   :  { %1719 = dma.done.wait [#allocation6], 9216  }
  0x49   :  { %1720 = vsyncadd [#allocation6], 4294958080 }
  0x4a   :  { %1721 = dma.done.wait [#allocation9], 8192  }
  0x4b   :  { %1722 = vsyncadd [#allocation9], 4294959104  ;;  %v1735_v0 = vmov 0   ;;  %v1379_v1 = vld [vmem:[#allocation5 + $0x4] ss:$8 sps:$4 sm:$0xff]   ;;  %vm145_vm0 = vcmask 523264  }
  0x4c   :  { %181 = vmatprep.mubr.bf16.mxu0 %v1735_v0  ;;  %v1381_v2 = vld [vmem:[#allocation5] ss:$8 sps:$4 sm:$0xff]   ;;  %149 = vmatprep.subr.bf16.mxu0 %v1379_v1  ;;  %v1382_v3 = vld [vmem:[#allocation5 + $0x14] ss:$8 sps:$4 sm:$0xff]   ;;  %v1384_v4 = vld [vmem:[#allocation5 + $0x10] ss:$8 sps:$4 sm:$0xff]   ;;  %v95_v0 = vlaneseq }
  0x4d   :  { %150 = vmatpush1.bf16.msra.mxu0 %v1381_v2  ;;  %v1385_v5 = vld [vmem:[#allocation5 + $0x24] ss:$8 sps:$4 sm:$0xff]   ;;  %v1387_v6 = vld [vmem:[#allocation5 + $0x20] ss:$8 sps:$4 sm:$0xff]   ;;  %v1388_v7 = vld [vmem:[#allocation5 + $0x34] ss:$8 sps:$4 sm:$0xff]  }
  0x4e   :  { %151 = vmatprep.subr.bf16.mxu0 %v1382_v3  ;;  %v1390_v8 = vld [vmem:[#allocation5 + $0x30] ss:$8 sps:$4 sm:$0xff]   ;;  %v1393_v9 = vld [vmem:[#allocation7 + $0x4] ss:$16 sps:$4 sm:$0xff]   ;;  %v84_v10 = vld [vmem:[#allocation2] sm:$0xf] }
  0x4f   :  { %v1391_v11 = vld [vmem:[#allocation7] ss:$16 sps:$4 sm:$0xff]   ;;  %v1396_v12 = vld [vmem:[#allocation7 + $0x24] ss:$16 sps:$4 sm:$0xff]   ;;  %v1441_v42 = vld [vmem:[#allocation7 + $0xc] ss:$16 sps:$4 sm:$0xff]  }
  0x50   :  { %v1394_v13 = vld [vmem:[#allocation7 + $0x20] ss:$16 sps:$4 sm:$0xff]   ;;  %v1399_v14 = vld [vmem:[#allocation7 + $0x44] ss:$16 sps:$4 sm:$0xff]   ;;  %v1837_v3 = vshrl.u32 %v95_v0, 7  ;;  %s1736_s12 = smov [#allocation11]  }
  0x51   :  { %152 = vmatpush1.bf16.msra.mxu0 %v1384_v4  ;;  %v1397_v15 = vld [vmem:[#allocation7 + $0x40] ss:$16 sps:$4 sm:$0xff]   ;;  %v1402_v16 = vld [vmem:[#allocation7 + $0x64] ss:$16 sps:$4 sm:$0xff]   ;;  %s1210_s13 = sshll.u32 %s1736_s12, 4  ;;  %s1211_s13 = int_to_ptr.vmem [resolvable:$true] %s1210_s13 }
  0x52   :  { %153 = vmatprep.subr.bf16.mxu0 %v1385_v5  ;;  %v1400_v17 = vld [vmem:[#allocation7 + $0x60] ss:$16 sps:$4 sm:$0xff]   ;;  %v1405_v18 = vld [vmem:[#allocation7 + $0x84] ss:$16 sps:$4 sm:$0xff]   ;;  %p1678_p5 = scmp.lt.s32.totalorder %s1211_s13, %s1211_s13 }
  0x53   :  { %v1403_v19 = vld [vmem:[#allocation7 + $0x80] ss:$16 sps:$4 sm:$0xff]   ;;  %v1408_v20 = vld [vmem:[#allocation7 + $0xa4] ss:$16 sps:$4 sm:$0xff]  }
  0x54   :  { %v1406_v21 = vld [vmem:[#allocation7 + $0xa0] ss:$16 sps:$4 sm:$0xff]   ;;  %v1411_v22 = vld [vmem:[#allocation7 + $0xc4] ss:$16 sps:$4 sm:$0xff]  }
  0x55   :  { %154 = vmatpush1.bf16.msra.mxu0 %v1387_v6  ;;  %v1409_v23 = vld [vmem:[#allocation7 + $0xc0] ss:$16 sps:$4 sm:$0xff]   ;;  %v1414_v24 = vld [vmem:[#allocation7 + $0xe4] ss:$16 sps:$4 sm:$0xff]   ;;  %v1840_v6 = vsub.s32 0, %v1837_v3 }
  0x56   :  { %155 = vmatprep.subr.bf16.mxu0 %v1388_v7  ;;  %v1412_v25 = vld [vmem:[#allocation7 + $0xe0] ss:$16 sps:$4 sm:$0xff]   ;;  %v1417_v26 = vld [vmem:[#allocation7 + $0x104] ss:$16 sps:$4 sm:$0xff]  }
  0x57   :  { %v1415_v27 = vld [vmem:[#allocation7 + $0x100] ss:$16 sps:$4 sm:$0xff]   ;;  %v1420_v28 = vld [vmem:[#allocation7 + $0x124] ss:$16 sps:$4 sm:$0xff]  }
  0x58   :  { %v1418_v29 = vld [vmem:[#allocation7 + $0x120] ss:$16 sps:$4 sm:$0xff]   ;;  %v1423_v30 = vld [vmem:[#allocation7 + $0x144] ss:$16 sps:$4 sm:$0xff]  }
  0x59   :  { %156 = vmatpush1.bf16.msra.mxu0 %v1390_v8  ;;  %v1421_v31 = vld [vmem:[#allocation7 + $0x140] ss:$16 sps:$4 sm:$0xff]   ;;  %v1426_v32 = vld [vmem:[#allocation7 + $0x164] ss:$16 sps:$4 sm:$0xff]   ;;  %v93_v8 = vld [vmem:[%s1898_s2] sm:$0x3] }
  0x5a   :  { %604 = vmatprep.subr.bf16.mxu0 %v1393_v9  ;;  %v1424_v33 = vld [vmem:[#allocation7 + $0x160] ss:$16 sps:$4 sm:$0xff]   ;;  %v1429_v34 = vld [vmem:[#allocation7 + $0x184] ss:$16 sps:$4 sm:$0xff]   ;;  %v1846_v9 = vsub.s32 1, %v1837_v3 }
  0x5b   :  { %v1427_v35 = vld [vmem:[#allocation7 + $0x180] ss:$16 sps:$4 sm:$0xff]   ;;  %v1432_v36 = vld [vmem:[#allocation7 + $0x1a4] ss:$16 sps:$4 sm:$0xff]  }
  0x5c   :  { %1233 = vmatmul.mubr.msk.bf16.vlgmr.msra.gmra.mrb[0].mxu0 %vm145_vm0, %v84_v10  ;;  %v1430_v37 = vld [vmem:[#allocation7 + $0x1a0] ss:$16 sps:$4 sm:$0xff]   ;;  %v1435_v38 = vld [vmem:[#allocation7 + $0x1c4] ss:$16 sps:$4 sm:$0xff]  }
  0x5d   :  { %605 = vmatpush1.bf16.msra.mxu0 %v1391_v11  ;;  %v1433_v39 = vld [vmem:[#allocation7 + $0x1c0] ss:$16 sps:$4 sm:$0xff]   ;;  %v1438_v40 = vld [vmem:[#allocation7 + $0x1e4] ss:$16 sps:$4 sm:$0xff]   ;;  %v98_v11 = vrot.slane %v93_v8, %v1840_v6 }
  0x5e   :  { %606 = vmatprep.subr.bf16.mxu0 %v1396_v12  ;;  %v1436_v41 = vld [vmem:[#allocation7 + $0x1e0] ss:$16 sps:$4 sm:$0xff]   ;;  %v1487_v43 = vld [vmem:[#allocation8 + $0x4] ss:$8 sps:$4 sm:$0xff]   ;;  %v1490_v45 = vld [vmem:[#allocation8 + $0x14] ss:$8 sps:$4 sm:$0xff]  }
  0x5f   :  { %v1489_v44 = vld [vmem:[#allocation8] ss:$8 sps:$4 sm:$0xff]   ;;  %1098 = vmatprep.subr.bf16.mxu1 %v1487_v43  ;;  %v1492_v46 = vld [vmem:[#allocation8 + $0x10] ss:$8 sps:$4 sm:$0xff]   ;;  %v1493_v47 = vld [vmem:[#allocation8 + $0x24] ss:$8 sps:$4 sm:$0xff]  }
  0x60   :  { %1099 = vmatpush1.bf16.msra.mxu1 %v1489_v44  ;;  %v1495_v48 = vld [vmem:[#allocation8 + $0x20] ss:$8 sps:$4 sm:$0xff]   ;;  %v1496_v49 = vld [vmem:[#allocation8 + $0x34] ss:$8 sps:$4 sm:$0xff]   ;;  %v1498_v50 = vld [vmem:[#allocation8 + $0x30] ss:$8 sps:$4 sm:$0xff]  }
  0x61   :  { %607 = vmatpush1.bf16.msra.mxu0 %v1394_v13  ;;  %1100 = vmatprep.subr.bf16.mxu1 %v1490_v45  ;;  %v1499_v51 = vld [vmem:[#allocation8 + $0x44] ss:$8 sps:$4 sm:$0xff]   ;;  %v1501_v52 = vld [vmem:[#allocation8 + $0x40] ss:$8 sps:$4 sm:$0xff]   ;;  %v1502_v53 = vld [vmem:[#allocation8 + $0x54] ss:$8 sps:$4 sm:$0xff]   ;;  %v102_v13 = vrot.slane %v93_v8, %v1846_v9 }
  0x62   :  { %608 = vmatprep.subr.bf16.mxu0 %v1399_v14  ;;  %v1504_v54 = vld [vmem:[#allocation8 + $0x50] ss:$8 sps:$4 sm:$0xff]   ;;  %v1505_v55 = vld [vmem:[#allocation8 + $0x64] ss:$8 sps:$4 sm:$0xff]   ;;  %v1507_v56 = vld [vmem:[#allocation8 + $0x60] ss:$8 sps:$4 sm:$0xff]  }
  0x63   :  { %v1508_v57 = vld [vmem:[#allocation8 + $0x74] ss:$8 sps:$4 sm:$0xff]   ;;  %v1510_v58 = vld [vmem:[#allocation8 + $0x70] ss:$8 sps:$4 sm:$0xff]   ;;  %v1511_v59 = vld [vmem:[#allocation8 + $0x84] ss:$8 sps:$4 sm:$0xff]  }
  0x64   :  { %1101 = vmatpush1.bf16.msra.mxu1 %v1492_v46  ;;  %v1513_v60 = vld [vmem:[#allocation8 + $0x80] ss:$8 sps:$4 sm:$0xff]   ;;  %v1514_v61 = vld [vmem:[#allocation8 + $0x94] ss:$8 sps:$4 sm:$0xff]   ;;  %v1516_v62 = vld [vmem:[#allocation8 + $0x90] ss:$8 sps:$4 sm:$0xff]  }
  0x65   :  { %609 = vmatpush1.bf16.msra.mxu0 %v1397_v15  ;;  %1102 = vmatprep.subr.bf16.mxu1 %v1493_v47  ;;  %v1517_v63 = vld [vmem:[#allocation8 + $0xa4] ss:$8 sps:$4 sm:$0xff]   ;;  %v1519_v1 = vld [vmem:[#allocation8 + $0xa0] ss:$8 sps:$4 sm:$0xff]   ;;  %v1520_v2 = vld [vmem:[#allocation8 + $0xb4] ss:$8 sps:$4 sm:$0xff]  }
  0x66   :  { %610 = vmatprep.subr.bf16.mxu0 %v1402_v16  ;;  %v1522_v4 = vld [vmem:[#allocation8 + $0xb0] ss:$8 sps:$4 sm:$0xff]   ;;  %v1523_v5 = vld [vmem:[#allocation8 + $0xc4] ss:$8 sps:$4 sm:$0xff]   ;;  %v1525_v7 = vld [vmem:[#allocation8 + $0xc0] ss:$8 sps:$4 sm:$0xff]  }
  0x67   :  { %v1526_v10 = vld [vmem:[#allocation8 + $0xd4] ss:$8 sps:$4 sm:$0xff]   ;;  %v1528_v12 = vld [vmem:[#allocation8 + $0xd0] ss:$8 sps:$4 sm:$0xff]  }
  0x68   :  { %1103 = vmatpush1.bf16.msra.mxu1 %v1495_v48  ;;  %v1468_v43 = vld [vmem:[#allocation7 + $0x12c] ss:$16 sps:$4 sm:$0xff]   ;;  %v1466_v44 = vld [vmem:[#allocation7 + $0x128] ss:$16 sps:$4 sm:$0xff]  }
  0x69   :  { %611 = vmatpush1.bf16.msra.mxu0 %v1400_v17  ;;  %1104 = vmatprep.subr.bf16.mxu1 %v1496_v49  ;;  %v1471_v45 = vld [vmem:[#allocation7 + $0x14c] ss:$16 sps:$4 sm:$0xff]   ;;  %v1469_v46 = vld [vmem:[#allocation7 + $0x148] ss:$16 sps:$4 sm:$0xff]  }
  0x6a   :  { %612 = vmatprep.subr.bf16.mxu0 %v1405_v18  ;;  %v1474_v47 = vld [vmem:[#allocation7 + $0x16c] ss:$16 sps:$4 sm:$0xff]   ;;  %v1472_v48 = vld [vmem:[#allocation7 + $0x168] ss:$16 sps:$4 sm:$0xff]  }
  0x6b   :  { %v1477_v49 = vld [vmem:[#allocation7 + $0x18c] ss:$16 sps:$4 sm:$0xff]  }
  0x6c   :  { %1105 = vmatpush1.bf16.msra.mxu1 %v1498_v50  ;;  %v1475_v50 = vld [vmem:[#allocation7 + $0x188] ss:$16 sps:$4 sm:$0xff]  }
  0x6d   :  { %613 = vmatpush1.bf16.msra.mxu0 %v1403_v19  ;;  %1106 = vmatprep.subr.bf16.mxu1 %v1499_v51  ;;  %v1480_v51 = vld [vmem:[#allocation7 + $0x1ac] ss:$16 sps:$4 sm:$0xff]  }
  0x6e   :  { %614 = vmatprep.subr.bf16.mxu0 %v1408_v20 }
  0x70   :  { %1107 = vmatpush1.bf16.msra.mxu1 %v1501_v52  ;;  %v1478_v52 = vld [vmem:[#allocation7 + $0x1a8] ss:$16 sps:$4 sm:$0xff]  }
  0x71   :  { %615 = vmatpush1.bf16.msra.mxu0 %v1406_v21  ;;  %1108 = vmatprep.subr.bf16.mxu1 %v1502_v53  ;;  %v1483_v53 = vld [vmem:[#allocation7 + $0x1cc] ss:$16 sps:$4 sm:$0xff]  }
  0x72   :  { %616 = vmatprep.subr.bf16.mxu0 %v1411_v22 }
  0x74   :  { %1109 = vmatpush1.bf16.msra.mxu1 %v1504_v54  ;;  %v1481_v54 = vld [vmem:[#allocation7 + $0x1c8] ss:$16 sps:$4 sm:$0xff]  }
  0x75   :  { %617 = vmatpush1.bf16.msra.mxu0 %v1409_v23  ;;  %1110 = vmatprep.subr.bf16.mxu1 %v1505_v55  ;;  %v1486_v55 = vld [vmem:[#allocation7 + $0x1ec] ss:$16 sps:$4 sm:$0xff]  }
  0x76   :  { %618 = vmatprep.subr.bf16.mxu0 %v1414_v24 }
  0x78   :  { %1111 = vmatpush1.bf16.msra.mxu1 %v1507_v56  ;;  %v1484_v56 = vld [vmem:[#allocation7 + $0x1e8] ss:$16 sps:$4 sm:$0xff]  }
  0x79   :  { %619 = vmatpush1.bf16.msra.mxu0 %v1412_v25  ;;  %1112 = vmatprep.subr.bf16.mxu1 %v1508_v57  ;;  %v1439_v25 = vld [vmem:[#allocation7 + $0x8] ss:$16 sps:$4 sm:$0xff]   ;;  %v1529_v57 = vld [vmem:[#allocation8 + $0xe4] ss:$8 sps:$4 sm:$0xff]  }
  0x7a   :  { %620 = vmatprep.subr.bf16.mxu0 %v1417_v26 }
  0x7c   :  { %1113 = vmatpush1.bf16.msra.mxu1 %v1510_v58  ;;  %v1531_v58 = vld [vmem:[#allocation8 + $0xe0] ss:$8 sps:$4 sm:$0xff]  }
  0x7d   :  { %621 = vmatpush1.bf16.msra.mxu0 %v1415_v27  ;;  %1114 = vmatprep.subr.bf16.mxu1 %v1511_v59  ;;  %v1444_v27 = vld [vmem:[#allocation7 + $0x2c] ss:$16 sps:$4 sm:$0xff]  }
  0x7e   :  { %622 = vmatprep.subr.bf16.mxu0 %v1420_v28  ;;  %v1442_v28 = vld [vmem:[#allocation7 + $0x28] ss:$16 sps:$4 sm:$0xff]   ;;  %v1532_v59 = vld [vmem:[#allocation8 + $0xf4] ss:$8 sps:$4 sm:$0xff]  }
  0x80   :  { %1115 = vmatpush1.bf16.msra.mxu1 %v1513_v60  ;;  %v1534_v60 = vld [vmem:[#allocation8 + $0xf0] ss:$8 sps:$4 sm:$0xff]  }
  0x81   :  { %623 = vmatpush1.bf16.msra.mxu0 %v1418_v29  ;;  %1116 = vmatprep.subr.bf16.mxu1 %v1514_v61  ;;  %v1447_v29 = vld [vmem:[#allocation7 + $0x4c] ss:$16 sps:$4 sm:$0xff]  }
  0x82   :  { %624 = vmatprep.subr.bf16.mxu0 %v1423_v30  ;;  %v1445_v30 = vld [vmem:[#allocation7 + $0x48] ss:$16 sps:$4 sm:$0xff]   ;;  %v1537_v61 = vld [vmem:[#allocation8 + $0x104] ss:$8 sps:$4 sm:$0xff]  }
  0x84   :  { %1117 = vmatpush1.bf16.msra.mxu1 %v1516_v62  ;;  %v1857_v62 = vld [vmem:[%s1900_s4] sm:$0xf] }
  0x85   :  { %625 = vmatpush1.bf16.msra.mxu0 %v1421_v31  ;;  %1118 = vmatprep.subr.bf16.mxu1 %v1517_v63  ;;  %v1450_v31 = vld [vmem:[#allocation7 + $0x6c] ss:$16 sps:$4 sm:$0xff]   ;;  %v267_v63 = vrot.slane %v1857_v62, %v1840_v6  ;;  %v271_v0 = vrot.slane %v1857_v62, %v1846_v9 }
  0x86   :  { %626 = vmatprep.subr.bf16.mxu0 %v1426_v32  ;;  %v1448_v32 = vld [vmem:[#allocation7 + $0x68] ss:$16 sps:$4 sm:$0xff]  }
  0x88   :  { %1119 = vmatpush1.bf16.msra.mxu1 %v1519_v1 }
  0x89   :  { %627 = vmatpush1.bf16.msra.mxu0 %v1424_v33  ;;  %1120 = vmatprep.subr.bf16.mxu1 %v1520_v2  ;;  %v1453_v33 = vld [vmem:[#allocation7 + $0x8c] ss:$16 sps:$4 sm:$0xff]  }
  0x8a   :  { %628 = vmatprep.subr.bf16.mxu0 %v1429_v34  ;;  %v1451_v34 = vld [vmem:[#allocation7 + $0x88] ss:$16 sps:$4 sm:$0xff]  }
  0x8c   :  { %1121 = vmatpush1.bf16.msra.mxu1 %v1522_v4 }
  0x8d   :  { %629 = vmatpush1.bf16.msra.mxu0 %v1427_v35  ;;  %1122 = vmatprep.subr.bf16.mxu1 %v1523_v5  ;;  %v1456_v35 = vld [vmem:[#allocation7 + $0xac] ss:$16 sps:$4 sm:$0xff]  }
  0x8e   :  { %630 = vmatprep.subr.bf16.mxu0 %v1432_v36  ;;  %v1454_v36 = vld [vmem:[#allocation7 + $0xa8] ss:$16 sps:$4 sm:$0xff]  }
  0x90   :  { %1123 = vmatpush1.bf16.msra.mxu1 %v1525_v7 }
  0x91   :  { %631 = vmatpush1.bf16.msra.mxu0 %v1430_v37  ;;  %1124 = vmatprep.subr.bf16.mxu1 %v1526_v10  ;;  %v1459_v37 = vld [vmem:[#allocation7 + $0xcc] ss:$16 sps:$4 sm:$0xff]  }
  0x92   :  { %632 = vmatprep.subr.bf16.mxu0 %v1435_v38  ;;  %v1457_v38 = vld [vmem:[#allocation7 + $0xc8] ss:$16 sps:$4 sm:$0xff]  }
  0x94   :  { %1125 = vmatpush1.bf16.msra.mxu1 %v1528_v12 }
  0x95   :  { %633 = vmatpush1.bf16.msra.mxu0 %v1433_v39  ;;  %v1462_v39 = vld [vmem:[#allocation7 + $0xec] ss:$16 sps:$4 sm:$0xff]   ;;  %1126 = vmatprep.subr.bf16.mxu1 %v1529_v57 }
  0x96   :  { %634 = vmatprep.subr.bf16.mxu0 %v1438_v40  ;;  %v1460_v40 = vld [vmem:[#allocation7 + $0xe8] ss:$16 sps:$4 sm:$0xff]  }
  0x98   :  { %1127 = vmatpush1.bf16.msra.mxu1 %v1531_v58 }
  0x99   :  { %635 = vmatpush1.bf16.msra.mxu0 %v1436_v41  ;;  %v1465_v41 = vld [vmem:[#allocation7 + $0x10c] ss:$16 sps:$4 sm:$0xff]   ;;  %1128 = vmatprep.subr.bf16.mxu1 %v1532_v59 }
  0x9a   :  { %645 = vmatprep.subr.bf16.mxu0 %v1441_v42  ;;  %v1463_v42 = vld [vmem:[#allocation7 + $0x108] ss:$16 sps:$4 sm:$0xff]  }
  0x9c   :  { %1129 = vmatpush1.bf16.msra.mxu1 %v1534_v60 }
  0x9d   :  { %1139 = vmatprep.subr.bf16.mxu1 %v1537_v61 }
 0x12f   :  { %v183_v14 = vpop.f32.mrb[0].mxu0 }
 0x130   :  { %v184_v15 = vadd.f32 %v183_v14, %v98_v11  ;;  %v185_v16 = vpop.f32.mrb[1].mxu0 }
 0x131   :  { %v186_v17 = vadd.f32 %v185_v16, %v102_v13  ;;  %v187_v18 = vpop.f32.mrb[2].mxu0 }
 0x132   :  { %vm190_vm1 = vcmp.gt.f32.partialorder %v184_v15, 0.0  ;;  %v192_v19 = vmul.f32 0.01, %v184_v15  ;;  %v188_v20 = vpop.f32.mrb[3].mxu0  ;;  %v1538_v18 = vld [vmem:[#allocation8 + $0x110] ss:$8 sps:$4 sm:$0xff]  }
 0x133   :  { %vm191_vm2 = vcmp.gt.f32.partialorder %v186_v17, 0.0  ;;  %v193_v21 = vmul.f32 0.01, %v186_v17  ;;  %v1541_v20 = vld [vmem:[#allocation8 + $0x120] ss:$8 sps:$4 sm:$0xff]  }
 0x134   :  { %v194_v22 = vsel %vm190_vm1, %v184_v15, %v192_v19  ;;  %v1535_v15 = vld [vmem:[#allocation8 + $0x100] ss:$8 sps:$4 sm:$0xff]   ;;  %v1543_v19 = vld [vmem:[#allocation8 + $0x124] ss:$8 sps:$4 sm:$0xff]  }
 0x135   :  { %v195_v23 = vsel %vm191_vm2, %v186_v17, %v193_v21  ;;  %v1850_v26 = vpack.c.bf16 %v194_v22, %v194_v22  ;;  %v1540_v17 = vld [vmem:[#allocation8 + $0x114] ss:$8 sps:$4 sm:$0xff]   ;;  %v1544_v22 = vld [vmem:[#allocation8 + $0x130] ss:$8 sps:$4 sm:$0xff]  }
 0x136   :  { %v197_v24 = vpack.c.bf16 %v195_v23, %v195_v23  ;;  %v1546_v21 = vld [vmem:[#allocation8 + $0x134] ss:$8 sps:$4 sm:$0xff]   ;;  %v1549_v23 = vld [vmem:[#allocation8 + $0x144] ss:$8 sps:$4 sm:$0xff]  }
 0x138   :  { %636 = vmatprep.mubr.bf16.mxu0 %v197_v24 }
 0x139   :  { %637 = vmatmul.mubr.bf16.vlgmr.msra.gmra.mrb[4].mxu0 %v1850_v26 }
 0x13a   :  { %646 = vmatpush1.bf16.msra.mxu0 %v1439_v25  ;;  %677 = vmatprep.mubr.bf16.mxu0 %v197_v24  ;;  %v1547_v24 = vld [vmem:[#allocation8 + $0x140] ss:$8 sps:$4 sm:$0xff]   ;;  %v1552_v25 = vld [vmem:[#allocation8 + $0x154] ss:$8 sps:$4 sm:$0xff]  }
 0x13b   :  { %647 = vmatprep.subr.bf16.mxu0 %v1444_v27  ;;  %v1555_v27 = vld [vmem:[#allocation8 + $0x164] ss:$8 sps:$4 sm:$0xff]  }
 0x13e   :  { %648 = vmatpush1.bf16.msra.mxu0 %v1442_v28  ;;  %v1553_v28 = vld [vmem:[#allocation8 + $0x160] ss:$8 sps:$4 sm:$0xff]  }
 0x13f   :  { %649 = vmatprep.subr.bf16.mxu0 %v1447_v29  ;;  %v1558_v29 = vld [vmem:[#allocation8 + $0x174] ss:$8 sps:$4 sm:$0xff]  }
 0x142   :  { %650 = vmatpush1.bf16.msra.mxu0 %v1445_v30  ;;  %v1556_v30 = vld [vmem:[#allocation8 + $0x170] ss:$8 sps:$4 sm:$0xff]  }
 0x143   :  { %651 = vmatprep.subr.bf16.mxu0 %v1450_v31  ;;  %v1561_v31 = vld [vmem:[#allocation8 + $0x184] ss:$8 sps:$4 sm:$0xff]  }
 0x146   :  { %652 = vmatpush1.bf16.msra.mxu0 %v1448_v32  ;;  %v1559_v32 = vld [vmem:[#allocation8 + $0x180] ss:$8 sps:$4 sm:$0xff]  }
 0x147   :  { %653 = vmatprep.subr.bf16.mxu0 %v1453_v33  ;;  %v1564_v33 = vld [vmem:[#allocation8 + $0x194] ss:$8 sps:$4 sm:$0xff]  }
 0x14a   :  { %654 = vmatpush1.bf16.msra.mxu0 %v1451_v34  ;;  %v1562_v34 = vld [vmem:[#allocation8 + $0x190] ss:$8 sps:$4 sm:$0xff]  }
 0x14b   :  { %655 = vmatprep.subr.bf16.mxu0 %v1456_v35  ;;  %v1567_v35 = vld [vmem:[#allocation8 + $0x1a4] ss:$8 sps:$4 sm:$0xff]  }
 0x14e   :  { %656 = vmatpush1.bf16.msra.mxu0 %v1454_v36  ;;  %v1565_v36 = vld [vmem:[#allocation8 + $0x1a0] ss:$8 sps:$4 sm:$0xff]  }
 0x14f   :  { %657 = vmatprep.subr.bf16.mxu0 %v1459_v37  ;;  %v1570_v37 = vld [vmem:[#allocation8 + $0x1b4] ss:$8 sps:$4 sm:$0xff]  }
 0x152   :  { %658 = vmatpush1.bf16.msra.mxu0 %v1457_v38  ;;  %v1568_v38 = vld [vmem:[#allocation8 + $0x1b0] ss:$8 sps:$4 sm:$0xff]  }
 0x153   :  { %659 = vmatprep.subr.bf16.mxu0 %v1462_v39  ;;  %v1573_v39 = vld [vmem:[#allocation8 + $0x1c4] ss:$8 sps:$4 sm:$0xff]  }
 0x156   :  { %660 = vmatpush1.bf16.msra.mxu0 %v1460_v40  ;;  %v1571_v40 = vld [vmem:[#allocation8 + $0x1c0] ss:$8 sps:$4 sm:$0xff]  }
 0x157   :  { %661 = vmatprep.subr.bf16.mxu0 %v1465_v41  ;;  %v1576_v41 = vld [vmem:[#allocation8 + $0x1d4] ss:$8 sps:$4 sm:$0xff]  }
 0x15a   :  { %662 = vmatpush1.bf16.msra.mxu0 %v1463_v42  ;;  %v274_v42 = vsub.s32 2, %v1837_v3 }
 0x15b   :  { %663 = vmatprep.subr.bf16.mxu0 %v1468_v43  ;;  %v278_v43 = vsub.s32 3, %v1837_v3 }
 0x15e   :  { %664 = vmatpush1.bf16.msra.mxu0 %v1466_v44  ;;  %v1574_v44 = vld [vmem:[#allocation8 + $0x1d0] ss:$8 sps:$4 sm:$0xff]  }
 0x15f   :  { %665 = vmatprep.subr.bf16.mxu0 %v1471_v45  ;;  %v1579_v45 = vld [vmem:[#allocation8 + $0x1e4] ss:$8 sps:$4 sm:$0xff]  }
 0x162   :  { %666 = vmatpush1.bf16.msra.mxu0 %v1469_v46  ;;  %v275_v46 = vrot.slane %v1857_v62, %v274_v42 }
 0x163   :  { %667 = vmatprep.subr.bf16.mxu0 %v1474_v47  ;;  %v279_v47 = vrot.slane %v1857_v62, %v278_v43  ;;  %v766_v62 = vld [vmem:[%s1902_s6] sm:$0x3]  ;;  %s1673_s6 = scalar_lea.vmem %s1211_s13, 256 }
 0x164   :  { %p1674_p4 = scmp.ne.s32.totalorder %s1211_s13, %s1673_s6  ;;  %p1679_p6 = scmp.lt.s32.totalorder %s1673_s6, %s1673_s6 }
 0x166   :  { %668 = vmatpush1.bf16.msra.mxu0 %v1472_v48  ;;  %v1577_v48 = vld [vmem:[#allocation8 + $0x1e0] ss:$8 sps:$4 sm:$0xff]   ;;  %p1680_p7 = por %p1679_p6, %p1678_p5 }
 0x167   :  { %669 = vmatprep.subr.bf16.mxu0 %v1477_v49 }
 0x168   :  { %p1681_p8 = pnand %p1680_p7, %p1674_p4 }
 0x16a   :  { %670 = vmatpush1.bf16.msra.mxu0 %v1475_v50  ;;  %v1582_v50 = vld [vmem:[#allocation8 + $0x1f4] ss:$8 sps:$4 sm:$0xff]  }
 0x16b   :  { %671 = vmatprep.subr.bf16.mxu0 %v1480_v51 }
 0x16e   :  { %672 = vmatpush1.bf16.msra.mxu0 %v1478_v52 }
 0x16f   :  { %673 = vmatprep.subr.bf16.mxu0 %v1483_v53 }
 0x172   :  { %674 = vmatpush1.bf16.msra.mxu0 %v1481_v54 }
 0x173   :  { %675 = vmatprep.subr.bf16.mxu0 %v1486_v55 }
 0x176   :  { %676 = vmatpush1.bf16.msra.mxu0 %v1484_v56  ;;  %v1580_v56 = vld [vmem:[#allocation8 + $0x1f0] ss:$8 sps:$4 sm:$0xff]  }
 0x179   :  { %678 = vmatmul.mubr.bf16.vlgmr.msra.gmra.mrb[8].mxu0 %v1850_v26  ;;  %v1550_v26 = vld [vmem:[#allocation8 + $0x150] ss:$8 sps:$4 sm:$0xff]  }
 0x20c   :  { %v638_v1 = vpop.f32.mrb[4].mxu0 }
 0x20d   :  { %v639_v2 = vadd.f32 %v638_v1, %v267_v63  ;;  %v640_v4 = vpop.f32.mrb[5].mxu0  ;;  %v771_v63 = vrot.slane %v766_v62, %v1840_v6 }
 0x20e   :  { %v641_v5 = vadd.f32 %v640_v4, %v271_v0  ;;  %v642_v7 = vpop.f32.mrb[6].mxu0  ;;  %v775_v0 = vrot.slane %v766_v62, %v1846_v9 }
 0x20f   :  { %vm686_vm3 = vcmp.gt.f32.partialorder %v639_v2, 0.0  ;;  %v690_v8 = vmul.f32 0.01, %v639_v2  ;;  %v643_v10 = vpop.f32.mrb[7].mxu0 }
 0x210   :  { %vm687_vm4 = vcmp.gt.f32.partialorder %v641_v5, 0.0  ;;  %v691_v11 = vmul.f32 0.01, %v641_v5 }
 0x211   :  { %v694_v12 = vsel %vm686_vm3, %v639_v2, %v690_v8 }
 0x212   :  { %v695_v13 = vsel %vm687_vm4, %v641_v5, %v691_v11  ;;  %v698_v16 = vpack.c.bf16 %v694_v12, %v694_v12 }
 0x213   :  { %v699_v14 = vpack.c.bf16 %v695_v13, %v695_v13 }
 0x215   :  { %1130 = vmatprep.mubr.bf16.mxu1 %v699_v14 }
 0x216   :  { %1131 = vmatmul.mubr.bf16.vlgmr.msra.gmra.mrb[0].mxu1 %v698_v16 }
 0x217   :  { %1140 = vmatpush1.bf16.msra.mxu1 %v1535_v15 }
 0x218   :  { %1141 = vmatprep.subr.bf16.mxu1 %v1540_v17 }
 0x21b   :  { %1142 = vmatpush1.bf16.msra.mxu1 %v1538_v18 }
 0x21c   :  { %1143 = vmatprep.subr.bf16.mxu1 %v1543_v19 }
 0x21f   :  { %1144 = vmatpush1.bf16.msra.mxu1 %v1541_v20 }
 0x220   :  { %1145 = vmatprep.subr.bf16.mxu1 %v1546_v21 }
 0x223   :  { %1146 = vmatpush1.bf16.msra.mxu1 %v1544_v22 }
 0x224   :  { %1147 = vmatprep.subr.bf16.mxu1 %v1549_v23 }
 0x227   :  { %1148 = vmatpush1.bf16.msra.mxu1 %v1547_v24 }
 0x228   :  { %1149 = vmatprep.subr.bf16.mxu1 %v1552_v25 }
 0x22b   :  { %1150 = vmatpush1.bf16.msra.mxu1 %v1550_v26 }
 0x22c   :  { %1151 = vmatprep.subr.bf16.mxu1 %v1555_v27 }
 0x22f   :  { %1152 = vmatpush1.bf16.msra.mxu1 %v1553_v28 }
 0x230   :  { %1153 = vmatprep.subr.bf16.mxu1 %v1558_v29 }
 0x233   :  { %1154 = vmatpush1.bf16.msra.mxu1 %v1556_v30 }
 0x234   :  { %1155 = vmatprep.subr.bf16.mxu1 %v1561_v31 }
 0x237   :  { %1156 = vmatpush1.bf16.msra.mxu1 %v1559_v32 }
 0x238   :  { %1157 = vmatprep.subr.bf16.mxu1 %v1564_v33 }
 0x23b   :  { %1158 = vmatpush1.bf16.msra.mxu1 %v1562_v34 }
 0x23c   :  { %1159 = vmatprep.subr.bf16.mxu1 %v1567_v35 }
 0x23f   :  { %1160 = vmatpush1.bf16.msra.mxu1 %v1565_v36 }
 0x240   :  { %1161 = vmatprep.subr.bf16.mxu1 %v1570_v37 }
 0x243   :  { %1162 = vmatpush1.bf16.msra.mxu1 %v1568_v38 }
 0x244   :  { %1163 = vmatprep.subr.bf16.mxu1 %v1573_v39 }
 0x247   :  { %1164 = vmatpush1.bf16.msra.mxu1 %v1571_v40 }
 0x248   :  { %1165 = vmatprep.subr.bf16.mxu1 %v1576_v41 }
 0x24b   :  { %1166 = vmatpush1.bf16.msra.mxu1 %v1574_v44 }
 0x24c   :  { %v679_v49 = vpop.f32.mrb[8].mxu0  ;;  %1167 = vmatprep.subr.bf16.mxu1 %v1579_v45 }
 0x24d   :  { %v680_v51 = vadd.f32 %v679_v49, %v275_v46  ;;  %v681_v52 = vpop.f32.mrb[9].mxu0 }
 0x24e   :  { %v682_v53 = vadd.f32 %v681_v52, %v279_v47  ;;  %v683_v54 = vpop.f32.mrb[10].mxu0 }
 0x24f   :  { %vm688_vm5 = vcmp.gt.f32.partialorder %v680_v51, 0.0  ;;  %v692_v55 = vmul.f32 0.01, %v680_v51  ;;  %v684_v3 = vpop.f32.mrb[11].mxu0  ;;  %1168 = vmatpush1.bf16.msra.mxu1 %v1577_v48 }
 0x250   :  { %vm689_vm6 = vcmp.gt.f32.partialorder %v682_v53, 0.0  ;;  %v693_v57 = vmul.f32 0.01, %v682_v53  ;;  %1169 = vmatprep.subr.bf16.mxu1 %v1582_v50 }
 0x251   :  { %v696_v58 = vsel %vm688_vm5, %v680_v51, %v692_v55 }
 0x252   :  { %v697_v59 = vsel %vm689_vm6, %v682_v53, %v693_v57  ;;  %v700_v61 = vpack.c.bf16 %v696_v58, %v696_v58 }
 0x253   :  { %1170 = vmatpush1.bf16.msra.mxu1 %v1580_v56  ;;  %v701_v60 = vpack.c.bf16 %v697_v59, %v697_v59 }
 0x255   :  { %1171 = vmatprep.mubr.bf16.mxu1 %v701_v60 }
 0x256   :  { %1172 = vmatmul.mubr.bf16.vlgmr.msra.gmra.mrb[0].mxu1 %v700_v61 }
 0x329   :  { %v1173_v1 = vpop.f32.mrb[0].mxu1 }
 0x32a   :  { %v1362_v2 = vadd.f32 %v1173_v1, %v771_v63  ;;  %v1175_v4 = vpop.f32.mrb[1].mxu1 }
 0x32b   :  { %v1363_v5 = vadd.f32 %v1175_v4, %v775_v0  ;;  %v1177_v7 = vpop.f32.mrb[2].mxu1 }
 0x32c   :  { %1190 = vst [vmem:[#allocation11] sm:$0xff] %v1362_v2  ;;  %v1178_v8 = vpop.f32.mrb[3].mxu1  ;;  %v1180_v10 = vmul.f32 %v1362_v2, %v1362_v2 }
 0x32d   :  { %1191 = vst [vmem:[#allocation11 + $0x8] sm:$0xff] %v1363_v5  ;;  %v1181_v11 = vmul.f32 %v1363_v5, %v1363_v5 }
 0x32f   :  { %v1182_v12 = vadd.f32 %v1181_v11, %v1180_v10 }
 0x331   :  { %1183 = vadd.xlane.f32.xlu0 %v1182_v12 }
 0x332   :  { %1684 = shalt.err (!%p1681_p8)
}
 0x333   :  { %s1685_s18 = scalar_lea.hbm %s1904_s8, 256 }
 0x334   :  { %p1686_p9 = scmp.ne.s32.totalorder %s1904_s8, %s1685_s18  ;;  %p1689_p10 = scmp.lt.u32.totalorder %s1685_s18, %s1904_s8 }
 0x336   :  { %p1691_p11 = pnand %p1689_p10, %p1686_p9 }
 0x338   :  { %1694 = shalt.err (!%p1691_p11)
}
 0x339   :  { %1213 = dma.vmem_to_hbm [thread:$0]  %s1211_s13, 256, %s1904_s8, [#allocation12]  }
 0x33a   :  { %s1737_s25 = smov [#allocation10]  }
 0x33b   :  { %s1200_s26 = sshll.u32 %s1737_s25, 4  ;;  %s1201_s26 = int_to_ptr.vmem [resolvable:$true] %s1200_s26 }
 0x33c   :  { %s1695_s27 = scalar_lea.vmem %s1201_s26, 256  ;;  %p1700_p13 = scmp.lt.s32.totalorder %s1201_s26, %s1201_s26 }
 0x33d   :  { %p1696_p12 = scmp.ne.s32.totalorder %s1201_s26, %s1695_s27  ;;  %p1701_p0 = scmp.lt.s32.totalorder %s1695_s27, %s1695_s27 }
 0x33f   :  { %p1702_p1 = por %p1701_p0, %p1700_p13 }
 0x341   :  { %p1703_p2 = pnand %p1702_p1, %p1696_p12 }
 0x3be   :  { %v1184_v6 = vpop.xlane.xlu0 %1183 }
 0x3bf   :  { %1583 = vrsqrt.f32 %v1184_v6  ;;  %vm1185_vm7 = vcmp.gt.f32.partialorder %v1184_v6, 0.0 }
 0x3c9   :  { %v1584_v9 = vpop.eup %1583 }
 0x3ca   :  { %v1187_v13 = vsel %vm1185_vm7, %v1584_v9, 0.0 }
 0x3cb   :  { %v1188_v14 = vmul.f32 %v1362_v2, %v1187_v13  ;;  %v1189_v15 = vmul.f32 %v1363_v5, %v1187_v13 }
 0x3cd   :  { %1192 = vst [vmem:[#allocation10] sm:$0xff] %v1188_v14  ;;  %1193 = vst [vmem:[#allocation10 + $0x8] sm:$0xff] %v1189_v15 }
 0x3ce   :  { %1706 = shalt.err (!%p1703_p2)
}
 0x3cf   :  { %s1707_s30 = scalar_lea.hbm %s1903_s7, 256 }
 0x3d0   :  { %p1708_p3 = scmp.ne.s32.totalorder %s1903_s7, %s1707_s30  ;;  %p1711_p4 = scmp.lt.u32.totalorder %s1707_s30, %s1903_s7 }
 0x3d2   :  { %p1713_p5 = pnand %p1711_p4, %p1708_p3 }
 0x3d4   :  { %1716 = shalt.err (!%p1713_p5)
}
 0x3d5   :  { %1203 = dma.vmem_to_hbm [thread:$0]  %s1201_s26, 256, %s1903_s7, [#allocation4]  }
 0x3d6   :  { %1723 = dma.done.wait [#allocation4], 256  }
 0x3d7   :  { %1724 = vsyncadd [#allocation4], 4294967040 }
 0x3d8   :  { %1725 = dma.done.wait [#allocation12], 256  }
 0x3d9   :  { %1726 = vsyncadd [#allocation12], 4294967040 }
 0x3da   :  { %1220 = vsyncpa [#allocation3], 1 }
 0x3db   :  { %1221 = vsyncpa [#allocation6], 1 }
 0x3dc   :  { %1222 = vsyncpa [#allocation9], 1 }
 0x3dd   :  { %1223 = vsyncpa [#allocation4], 1 }
 0x3de   :  { %1224 = vsyncpa [#allocation12], 1 }

// kernel: tpu_custom_call.1
= control target key start
LH: loop header
LB: loop body
LE: loop exit
PB: predicated region body
PF: predicated region fallthrough
CT: control target
= control target key end

     0   :  { %14 = vsyncpa [#allocation3], 0  ;;  %s1896_s0 = inlined_call_operand.hbm [shape: bf16[8,64], index: 0, kind: input, shape index: {}]   ;;  %s1897_s1 = inlined_call_operand.hbm [shape: bf16[1,64,256], index: 1, kind: input, shape index: {}]   ;;  %s1898_s2 = inlined_call_operand.vmem [shape: f32[1,256], index: 2, kind: input, shape index: {}]   ;;  %s1899_s3 = inlined_call_operand.hbm [shape: bf16[256,512], index: 3, kind: input, shape index: {}]   ;;  %s1900_s4 = inlined_call_operand.vmem [shape: f32[1,512], index: 4, kind: input, shape index: {}]   ;;  %s1901_s5 = inlined_call_operand.hbm [shape: bf16[512,256], index: 5, kind: input, shape index: {}]   ;;  %s1902_s6 = inlined_call_operand.vmem [shape: f32[1,256], index: 6, kind: input, shape index: {}]   ;;  %s1903_s7 = inlined_call_operand.hbm [shape: f32[8,256], index: 7, kind: output, shape index: {0}]   ;;  %s1904_s8 = inlined_call_operand.hbm [shape: f32[8,256], index: 8, kind: output, shape index: {1}]  }
   0x1   :  { %15 = vsyncpa [#allocation6], 0 }
   0x2   :  { %16 = vsyncpa [#allocation9], 0 }
   0x3   :  { %17 = vsyncpa [#allocation4], 0 }
   0x4   :  { %18 = vsyncpa [#allocation12], 0  ;;  %s1727_s27 = smov [#allocation5]   ;;  %s1585_s9 = scalar_lea.hbm %s1897_s1, 1024 }
   0x5   :  { %s34_s28 = sshll.u32 %s1727_s27, 4  ;;  %p1586_p0 = scmp.ne.s32.totalorder %s1897_s1, %s1585_s9  ;;  %s35_s28 = int_to_ptr.vmem [resolvable:$true] %s34_s28 }
   0x6   :  { %p1589_p1 = scmp.lt.u32.totalorder %s1585_s9, %s1897_s1 }
   0x8   :  { %p1591_p2 = pnand %p1589_p1, %p1586_p0 }
   0xa   :  { %1594 = shalt.err (!%p1591_p2)
}
   0xb   :  { %s1595_s14 = scalar_lea.vmem %s35_s28, 1024  ;;  %p1600_p4 = scmp.lt.s32.totalorder %s35_s28, %s35_s28 }
   0xc   :  { %p1596_p3 = scmp.ne.s32.totalorder %s35_s28, %s1595_s14  ;;  %p1601_p5 = scmp.lt.s32.totalorder %s1595_s14, %s1595_s14 }
   0xe   :  { %p1602_p6 = por %p1601_p5, %p1600_p4 }
  0x10   :  { %p1603_p7 = pnand %p1602_p6, %p1596_p3 }
  0x12   :  { %1606 = shalt.err (!%p1603_p7)
}
  0x13   :  { %s1728_s15 = smov 128   ;;  %s1729_s16 = smov 8  }
  0x14   :  { %40 = dma.hbm_to_vmem [thread:$0]  %s1897_s1, 1024, %s35_s28, [#allocation6], %s1728_s15, %s1728_s15, %s1729_s16  }
  0x15   :  { %s1730_s19 = smov [#allocation2]   ;;  %s1731_s21 = smov [#allocation7]  }
  0x16   :  { %s25_s20 = sshll.u32 %s1730_s19, 4  ;;  %s48_s22 = sshll.u32 %s1731_s21, 4  ;;  %s26_s20 = int_to_ptr.vmem [resolvable:$true] %s25_s20  ;;  %s49_s22 = int_to_ptr.vmem [resolvable:$true] %s48_s22 }
  0x17   :  { %s1607_s25 = scalar_lea.hbm %s1896_s0, 64 }
  0x18   :  { %p1608_p8 = scmp.ne.s32.totalorder %s1896_s0, %s1607_s25  ;;  %p1611_p9 = scmp.lt.u32.totalorder %s1607_s25, %s1896_s0 }
  0x1a   :  { %p1613_p10 = pnand %p1611_p9, %p1608_p8 }
  0x1c   :  { %1616 = shalt.err (!%p1613_p10)
}
  0x1d   :  { %s1617_s1 = scalar_lea.vmem %s26_s20, 64  ;;  %p1622_p12 = scmp.lt.s32.totalorder %s26_s20, %s26_s20 }
  0x1e   :  { %p1618_p11 = scmp.ne.s32.totalorder %s26_s20, %s1617_s1  ;;  %p1623_p13 = scmp.lt.s32.totalorder %s1617_s1, %s1617_s1 }
  0x20   :  { %p1624_p0 = por %p1623_p13, %p1622_p12 }
  0x22   :  { %p1625_p1 = pnand %p1624_p0, %p1618_p11 }
  0x24   :  { %1628 = shalt.err (!%p1625_p1)
}
  0x25   :  { %28 = dma.hbm_to_vmem [thread:$0]  %s1896_s0, 64, %s26_s20, [#allocation3]  }
  0x26   :  { %s1629_s12 = scalar_lea.hbm %s1899_s3, 8192 }
  0x27   :  { %p1630_p2 = scmp.ne.s32.totalorder %s1899_s3, %s1629_s12  ;;  %p1633_p3 = scmp.lt.u32.totalorder %s1629_s12, %s1899_s3 }
  0x29   :  { %p1635_p4 = pnand %p1633_p3, %p1630_p2 }
  0x2b   :  { %1638 = shalt.err (!%p1635_p4)
}
  0x2c   :  { %s1639_s19 = scalar_lea.vmem %s49_s22, 8192  ;;  %p1644_p6 = scmp.lt.s32.totalorder %s49_s22, %s49_s22 }
  0x2d   :  { %p1640_p5 = scmp.ne.s32.totalorder %s49_s22, %s1639_s19  ;;  %p1645_p7 = scmp.lt.s32.totalorder %s1639_s19, %s1639_s19 }
  0x2f   :  { %p1646_p8 = por %p1645_p7, %p1644_p6 }
  0x31   :  { %p1647_p9 = pnand %p1646_p8, %p1640_p5 }
  0x33   :  { %1650 = shalt.err (!%p1647_p9)
}
  0x34   :  { %s1732_s0 = smov 256   ;;  %s1733_s20 = smov 16  }
  0x35   :  { %54 = dma.hbm_to_vmem [thread:$0]  %s1899_s3, 8192, %s49_s22, [#allocation6], %s1732_s0, %s1732_s0, %s1733_s20  }
  0x36   :  { %s1734_s24 = smov [#allocation8]   ;;  %s1651_s29 = scalar_lea.hbm %s1901_s5, 8192 }
  0x37   :  { %s62_s25 = sshll.u32 %s1734_s24, 4  ;;  %p1652_p10 = scmp.ne.s32.totalorder %s1901_s5, %s1651_s29  ;;  %s63_s25 = int_to_ptr.vmem [resolvable:$true] %s62_s25 }
  0x38   :  { %p1655_p11 = scmp.lt.u32.totalorder %s1651_s29, %s1901_s5 }
  0x3a   :  { %p1657_p12 = pnand %p1655_p11, %p1652_p10 }
  0x3c   :  { %1660 = shalt.err (!%p1657_p12)
}
  0x3d   :  { %s1661_s10 = scalar_lea.vmem %s63_s25, 8192  ;;  %p1666_p0 = scmp.lt.s32.totalorder %s63_s25, %s63_s25 }
  0x3e   :  { %p1662_p13 = scmp.ne.s32.totalorder %s63_s25, %s1661_s10  ;;  %p1667_p1 = scmp.lt.s32.totalorder %s1661_s10, %s1661_s10 }
  0x40   :  { %p1668_p2 = por %p1667_p1, %p1666_p0 }
  0x42   :  { %p1669_p3 = pnand %p1668_p2, %p1662_p13 }
  0x44   :  { %1672 = shalt.err (!%p1669_p3)
}
  0x45   :  { %68 = dma.hbm_to_vmem [thread:$0]  %s1901_s5, 8192, %s63_s25, [#allocation9], %s1728_s15, %s1728_s15, %s1729_s16  }
  0x46   :  { %1717 = dma.done.wait [#allocation3], 64  }
  0x47   :  { %1718 = vsyncadd [#allocation3], 4294967232 }
  0x48   :  { %1719 = dma.done.wait [#allocation6], 9216  }
  0x49   :  { %1720 = vsyncadd [#allocation6], 4294958080 }
  0x4a   :  { %1721 = dma.done.wait [#allocation9], 8192  }
  0x4b   :  { %1722 = vsyncadd [#allocation9], 4294959104  ;;  %v1735_v0 = vmov 0   ;;  %v1379_v1 = vld [vmem:[#allocation5 + $0x4] ss:$8 sps:$4 sm:$0xff]   ;;  %vm145_vm0 = vcmask 523264  }
  0x4c   :  { %181 = vmatprep.mubr.bf16.mxu0 %v1735_v0  ;;  %v1381_v2 = vld [vmem:[#allocation5] ss:$8 sps:$4 sm:$0xff]   ;;  %149 = vmatprep.subr.bf16.mxu0 %v1379_v1  ;;  %v1382_v3 = vld [vmem:[#allocation5 + $0x14] ss:$8 sps:$4 sm:$0xff]   ;;  %v1384_v4 = vld [vmem:[#allocation5 + $0x10] ss:$8 sps:$4 sm:$0xff]   ;;  %v95_v0 = vlaneseq }
  0x4d   :  { %150 = vmatpush1.bf16.msra.mxu0 %v1381_v2  ;;  %v1385_v5 = vld [vmem:[#allocation5 + $0x24] ss:$8 sps:$4 sm:$0xff]   ;;  %v1387_v6 = vld [vmem:[#allocation5 + $0x20] ss:$8 sps:$4 sm:$0xff]   ;;  %v1388_v7 = vld [vmem:[#allocation5 + $0x34] ss:$8 sps:$4 sm:$0xff]  }
  0x4e   :  { %151 = vmatprep.subr.bf16.mxu0 %v1382_v3  ;;  %v1390_v8 = vld [vmem:[#allocation5 + $0x30] ss:$8 sps:$4 sm:$0xff]   ;;  %v1393_v9 = vld [vmem:[#allocation7 + $0x4] ss:$16 sps:$4 sm:$0xff]   ;;  %v84_v10 = vld [vmem:[#allocation2] sm:$0xf] }
  0x4f   :  { %v1391_v11 = vld [vmem:[#allocation7] ss:$16 sps:$4 sm:$0xff]   ;;  %v1396_v12 = vld [vmem:[#allocation7 + $0x24] ss:$16 sps:$4 sm:$0xff]   ;;  %v1441_v42 = vld [vmem:[#allocation7 + $0xc] ss:$16 sps:$4 sm:$0xff]  }
  0x50   :  { %v1394_v13 = vld [vmem:[#allocation7 + $0x20] ss:$16 sps:$4 sm:$0xff]   ;;  %v1399_v14 = vld [vmem:[#allocation7 + $0x44] ss:$16 sps:$4 sm:$0xff]   ;;  %v1837_v3 = vshrl.u32 %v95_v0, 7  ;;  %s1736_s12 = smov [#allocation11]  }
  0x51   :  { %152 = vmatpush1.bf16.msra.mxu0 %v1384_v4  ;;  %v1397_v15 = vld [vmem:[#allocation7 + $0x40] ss:$16 sps:$4 sm:$0xff]   ;;  %v1402_v16 = vld [vmem:[#allocation7 + $0x64] ss:$16 sps:$4 sm:$0xff]   ;;  %s1210_s13 = sshll.u32 %s1736_s12, 4  ;;  %s1211_s13 = int_to_ptr.vmem [resolvable:$true] %s1210_s13 }
  0x52   :  { %153 = vmatprep.subr.bf16.mxu0 %v1385_v5  ;;  %v1400_v17 = vld [vmem:[#allocation7 + $0x60] ss:$16 sps:$4 sm:$0xff]   ;;  %v1405_v18 = vld [vmem:[#allocation7 + $0x84] ss:$16 sps:$4 sm:$0xff]   ;;  %p1678_p5 = scmp.lt.s32.totalorder %s1211_s13, %s1211_s13 }
  0x53   :  { %v1403_v19 = vld [vmem:[#allocation7 + $0x80] ss:$16 sps:$4 sm:$0xff]   ;;  %v1408_v20 = vld [vmem:[#allocation7 + $0xa4] ss:$16 sps:$4 sm:$0xff]  }
  0x54   :  { %v1406_v21 = vld [vmem:[#allocation7 + $0xa0] ss:$16 sps:$4 sm:$0xff]   ;;  %v1411_v22 = vld [vmem:[#allocation7 + $0xc4] ss:$16 sps:$4 sm:$0xff]  }
  0x55   :  { %154 = vmatpush1.bf16.msra.mxu0 %v1387_v6  ;;  %v1409_v23 = vld [vmem:[#allocation7 + $0xc0] ss:$16 sps:$4 sm:$0xff]   ;;  %v1414_v24 = vld [vmem:[#allocation7 + $0xe4] ss:$16 sps:$4 sm:$0xff]   ;;  %v1840_v6 = vsub.s32 0, %v1837_v3 }
  0x56   :  { %155 = vmatprep.subr.bf16.mxu0 %v1388_v7  ;;  %v1412_v25 = vld [vmem:[#allocation7 + $0xe0] ss:$16 sps:$4 sm:$0xff]   ;;  %v1417_v26 = vld [vmem:[#allocation7 + $0x104] ss:$16 sps:$4 sm:$0xff]  }
  0x57   :  { %v1415_v27 = vld [vmem:[#allocation7 + $0x100] ss:$16 sps:$4 sm:$0xff]   ;;  %v1420_v28 = vld [vmem:[#allocation7 + $0x124] ss:$16 sps:$4 sm:$0xff]  }
  0x58   :  { %v1418_v29 = vld [vmem:[#allocation7 + $0x120] ss:$16 sps:$4 sm:$0xff]   ;;  %v1423_v30 = vld [vmem:[#allocation7 + $0x144] ss:$16 sps:$4 sm:$0xff]  }
  0x59   :  { %156 = vmatpush1.bf16.msra.mxu0 %v1390_v8  ;;  %v1421_v31 = vld [vmem:[#allocation7 + $0x140] ss:$16 sps:$4 sm:$0xff]   ;;  %v1426_v32 = vld [vmem:[#allocation7 + $0x164] ss:$16 sps:$4 sm:$0xff]   ;;  %v93_v8 = vld [vmem:[%s1898_s2] sm:$0x3] }
  0x5a   :  { %604 = vmatprep.subr.bf16.mxu0 %v1393_v9  ;;  %v1424_v33 = vld [vmem:[#allocation7 + $0x160] ss:$16 sps:$4 sm:$0xff]   ;;  %v1429_v34 = vld [vmem:[#allocation7 + $0x184] ss:$16 sps:$4 sm:$0xff]   ;;  %v1846_v9 = vsub.s32 1, %v1837_v3 }
  0x5b   :  { %v1427_v35 = vld [vmem:[#allocation7 + $0x180] ss:$16 sps:$4 sm:$0xff]   ;;  %v1432_v36 = vld [vmem:[#allocation7 + $0x1a4] ss:$16 sps:$4 sm:$0xff]  }
  0x5c   :  { %1233 = vmatmul.mubr.msk.bf16.vlgmr.msra.gmra.mrb[0].mxu0 %vm145_vm0, %v84_v10  ;;  %v1430_v37 = vld [vmem:[#allocation7 + $0x1a0] ss:$16 sps:$4 sm:$0xff]   ;;  %v1435_v38 = vld [vmem:[#allocation7 + $0x1c4] ss:$16 sps:$4 sm:$0xff]  }
  0x5d   :  { %605 = vmatpush1.bf16.msra.mxu0 %v1391_v11  ;;  %v1433_v39 = vld [vmem:[#allocation7 + $0x1c0] ss:$16 sps:$4 sm:$0xff]   ;;  %v1438_v40 = vld [vmem:[#allocation7 + $0x1e4] ss:$16 sps:$4 sm:$0xff]   ;;  %v98_v11 = vrot.slane %v93_v8, %v1840_v6 }
  0x5e   :  { %606 = vmatprep.subr.bf16.mxu0 %v1396_v12  ;;  %v1436_v41 = vld [vmem:[#allocation7 + $0x1e0] ss:$16 sps:$4 sm:$0xff]   ;;  %v1487_v43 = vld [vmem:[#allocation8 + $0x4] ss:$8 sps:$4 sm:$0xff]   ;;  %v1490_v45 = vld [vmem:[#allocation8 + $0x14] ss:$8 sps:$4 sm:$0xff]  }
  0x5f   :  { %v1489_v44 = vld [vmem:[#allocation8] ss:$8 sps:$4 sm:$0xff]   ;;  %1098 = vmatprep.subr.bf16.mxu1 %v1487_v43  ;;  %v1492_v46 = vld [vmem:[#allocation8 + $0x10] ss:$8 sps:$4 sm:$0xff]   ;;  %v1493_v47 = vld [vmem:[#allocation8 + $0x24] ss:$8 sps:$4 sm:$0xff]  }
  0x60   :  { %1099 = vmatpush1.bf16.msra.mxu1 %v1489_v44  ;;  %v1495_v48 = vld [vmem:[#allocation8 + $0x20] ss:$8 sps:$4 sm:$0xff]   ;;  %v1496_v49 = vld [vmem:[#allocation8 + $0x34] ss:$8 sps:$4 sm:$0xff]   ;;  %v1498_v50 = vld [vmem:[#allocation8 + $0x30] ss:$8 sps:$4 sm:$0xff]  }
  0x61   :  { %607 = vmatpush1.bf16.msra.mxu0 %v1394_v13  ;;  %1100 = vmatprep.subr.bf16.mxu1 %v1490_v45  ;;  %v1499_v51 = vld [vmem:[#allocation8 + $0x44] ss:$8 sps:$4 sm:$0xff]   ;;  %v1501_v52 = vld [vmem:[#allocation8 + $0x40] ss:$8 sps:$4 sm:$0xff]   ;;  %v1502_v53 = vld [vmem:[#allocation8 + $0x54] ss:$8 sps:$4 sm:$0xff]   ;;  %v102_v13 = vrot.slane %v93_v8, %v1846_v9 }
  0x62   :  { %608 = vmatprep.subr.bf16.mxu0 %v1399_v14  ;;  %v1504_v54 = vld [vmem:[#allocation8 + $0x50] ss:$8 sps:$4 sm:$0xff]   ;;  %v1505_v55 = vld [vmem:[#allocation8 + $0x64] ss:$8 sps:$4 sm:$0xff]   ;;  %v1507_v56 = vld [vmem:[#allocation8 + $0x60] ss:$8 sps:$4 sm:$0xff]  }
  0x63   :  { %v1508_v57 = vld [vmem:[#allocation8 + $0x74] ss:$8 sps:$4 sm:$0xff]   ;;  %v1510_v58 = vld [vmem:[#allocation8 + $0x70] ss:$8 sps:$4 sm:$0xff]   ;;  %v1511_v59 = vld [vmem:[#allocation8 + $0x84] ss:$8 sps:$4 sm:$0xff]  }
  0x64   :  { %1101 = vmatpush1.bf16.msra.mxu1 %v1492_v46  ;;  %v1513_v60 = vld [vmem:[#allocation8 + $0x80] ss:$8 sps:$4 sm:$0xff]   ;;  %v1514_v61 = vld [vmem:[#allocation8 + $0x94] ss:$8 sps:$4 sm:$0xff]   ;;  %v1516_v62 = vld [vmem:[#allocation8 + $0x90] ss:$8 sps:$4 sm:$0xff]  }
  0x65   :  { %609 = vmatpush1.bf16.msra.mxu0 %v1397_v15  ;;  %1102 = vmatprep.subr.bf16.mxu1 %v1493_v47  ;;  %v1517_v63 = vld [vmem:[#allocation8 + $0xa4] ss:$8 sps:$4 sm:$0xff]   ;;  %v1519_v1 = vld [vmem:[#allocation8 + $0xa0] ss:$8 sps:$4 sm:$0xff]   ;;  %v1520_v2 = vld [vmem:[#allocation8 + $0xb4] ss:$8 sps:$4 sm:$0xff]  }
  0x66   :  { %610 = vmatprep.subr.bf16.mxu0 %v1402_v16  ;;  %v1522_v4 = vld [vmem:[#allocation8 + $0xb0] ss:$8 sps:$4 sm:$0xff]   ;;  %v1523_v5 = vld [vmem:[#allocation8 + $0xc4] ss:$8 sps:$4 sm:$0xff]   ;;  %v1525_v7 = vld [vmem:[#allocation8 + $0xc0] ss:$8 sps:$4 sm:$0xff]  }
  0x67   :  { %v1526_v10 = vld [vmem:[#allocation8 + $0xd4] ss:$8 sps:$4 sm:$0xff]   ;;  %v1528_v12 = vld [vmem:[#allocation8 + $0xd0] ss:$8 sps:$4 sm:$0xff]  }
  0x68   :  { %1103 = vmatpush1.bf16.msra.mxu1 %v1495_v48  ;;  %v1468_v43 = vld [vmem:[#allocation7 + $0x12c] ss:$16 sps:$4 sm:$0xff]   ;;  %v1466_v44 = vld [vmem:[#allocation7 + $0x128] ss:$16 sps:$4 sm:$0xff]  }
  0x69   :  { %611 = vmatpush1.bf16.msra.mxu0 %v1400_v17  ;;  %1104 = vmatprep.subr.bf16.mxu1 %v1496_v49  ;;  %v1471_v45 = vld [vmem:[#allocation7 + $0x14c] ss:$16 sps:$4 sm:$0xff]   ;;  %v1469_v46 = vld [vmem:[#allocation7 + $0x148] ss:$16 sps:$4 sm:$0xff]  }
  0x6a   :  { %612 = vmatprep.subr.bf16.mxu0 %v1405_v18  ;;  %v1474_v47 = vld [vmem:[#allocation7 + $0x16c] ss:$16 sps:$4 sm:$0xff]   ;;  %v1472_v48 = vld [vmem:[#allocation7 + $0x168] ss:$16 sps:$4 sm:$0xff]  }
  0x6b   :  { %v1477_v49 = vld [vmem:[#allocation7 + $0x18c] ss:$16 sps:$4 sm:$0xff]  }
  0x6c   :  { %1105 = vmatpush1.bf16.msra.mxu1 %v1498_v50  ;;  %v1475_v50 = vld [vmem:[#allocation7 + $0x188] ss:$16 sps:$4 sm:$0xff]  }
  0x6d   :  { %613 = vmatpush1.bf16.msra.mxu0 %v1403_v19  ;;  %1106 = vmatprep.subr.bf16.mxu1 %v1499_v51  ;;  %v1480_v51 = vld [vmem:[#allocation7 + $0x1ac] ss:$16 sps:$4 sm:$0xff]  }
  0x6e   :  { %614 = vmatprep.subr.bf16.mxu0 %v1408_v20 }
  0x70   :  { %1107 = vmatpush1.bf16.msra.mxu1 %v1501_v52  ;;  %v1478_v52 = vld [vmem:[#allocation7 + $0x1a8] ss:$16 sps:$4 sm:$0xff]  }
  0x71   :  { %615 = vmatpush1.bf16.msra.mxu0 %v1406_v21  ;;  %1108 = vmatprep.subr.bf16.mxu1 %v1502_v53  ;;  %v1483_v53 = vld [vmem:[#allocation7 + $0x1cc] ss:$16 sps:$4 sm:$0xff]  }
  0x72   :  { %616 = vmatprep.subr.bf16.mxu0 %v1411_v22 }
  0x74   :  { %1109 = vmatpush1.bf16.msra.mxu1 %v1504_v54  ;;  %v1481_v54 = vld [vmem:[#allocation7 + $0x1c8] ss:$16 sps:$4 sm:$0xff]  }
  0x75   :  { %617 = vmatpush1.bf16.msra.mxu0 %v1409_v23  ;;  %1110 = vmatprep.subr.bf16.mxu1 %v1505_v55  ;;  %v1486_v55 = vld [vmem:[#allocation7 + $0x1ec] ss:$16 sps:$4 sm:$0xff]  }
  0x76   :  { %618 = vmatprep.subr.bf16.mxu0 %v1414_v24 }
  0x78   :  { %1111 = vmatpush1.bf16.msra.mxu1 %v1507_v56  ;;  %v1484_v56 = vld [vmem:[#allocation7 + $0x1e8] ss:$16 sps:$4 sm:$0xff]  }
  0x79   :  { %619 = vmatpush1.bf16.msra.mxu0 %v1412_v25  ;;  %1112 = vmatprep.subr.bf16.mxu1 %v1508_v57  ;;  %v1439_v25 = vld [vmem:[#allocation7 + $0x8] ss:$16 sps:$4 sm:$0xff]   ;;  %v1529_v57 = vld [vmem:[#allocation8 + $0xe4] ss:$8 sps:$4 sm:$0xff]  }
  0x7a   :  { %620 = vmatprep.subr.bf16.mxu0 %v1417_v26 }
  0x7c   :  { %1113 = vmatpush1.bf16.msra.mxu1 %v1510_v58  ;;  %v1531_v58 = vld [vmem:[#allocation8 + $0xe0] ss:$8 sps:$4 sm:$0xff]  }
  0x7d   :  { %621 = vmatpush1.bf16.msra.mxu0 %v1415_v27  ;;  %1114 = vmatprep.subr.bf16.mxu1 %v1511_v59  ;;  %v1444_v27 = vld [vmem:[#allocation7 + $0x2c] ss:$16 sps:$4 sm:$0xff]  }
  0x7e   :  { %622 = vmatprep.subr.bf16.mxu0 %v1420_v28  ;;  %v1442_v28 = vld [vmem:[#allocation7 + $0x28] ss:$16 sps:$4 sm:$0xff]   ;;  %v1532_v59 = vld [vmem:[#allocation8 + $0xf4] ss:$8 sps:$4 sm:$0xff]  }
  0x80   :  { %1115 = vmatpush1.bf16.msra.mxu1 %v1513_v60  ;;  %v1534_v60 = vld [vmem:[#allocation8 + $0xf0] ss:$8 sps:$4 sm:$0xff]  }
  0x81   :  { %623 = vmatpush1.bf16.msra.mxu0 %v1418_v29  ;;  %1116 = vmatprep.subr.bf16.mxu1 %v1514_v61  ;;  %v1447_v29 = vld [vmem:[#allocation7 + $0x4c] ss:$16 sps:$4 sm:$0xff]  }
  0x82   :  { %624 = vmatprep.subr.bf16.mxu0 %v1423_v30  ;;  %v1445_v30 = vld [vmem:[#allocation7 + $0x48] ss:$16 sps:$4 sm:$0xff]   ;;  %v1537_v61 = vld [vmem:[#allocation8 + $0x104] ss:$8 sps:$4 sm:$0xff]  }
  0x84   :  { %1117 = vmatpush1.bf16.msra.mxu1 %v1516_v62  ;;  %v1857_v62 = vld [vmem:[%s1900_s4] sm:$0xf] }
  0x85   :  { %625 = vmatpush1.bf16.msra.mxu0 %v1421_v31  ;;  %1118 = vmatprep.subr.bf16.mxu1 %v1517_v63  ;;  %v1450_v31 = vld [vmem:[#allocation7 + $0x6c] ss:$16 sps:$4 sm:$0xff]   ;;  %v267_v63 = vrot.slane %v1857_v62, %v1840_v6  ;;  %v271_v0 = vrot.slane %v1857_v62, %v1846_v9 }
  0x86   :  { %626 = vmatprep.subr.bf16.mxu0 %v1426_v32  ;;  %v1448_v32 = vld [vmem:[#allocation7 + $0x68] ss:$16 sps:$4 sm:$0xff]  }
  0x88   :  { %1119 = vmatpush1.bf16.msra.mxu1 %v1519_v1 }
  0x89   :  { %627 = vmatpush1.bf16.msra.mxu0 %v1424_v33  ;;  %1120 = vmatprep.subr.bf16.mxu1 %v1520_v2  ;;  %v1453_v33 = vld [vmem:[#allocation7 + $0x8c] ss:$16 sps:$4 sm:$0xff]  }
  0x8a   :  { %628 = vmatprep.subr.bf16.mxu0 %v1429_v34  ;;  %v1451_v34 = vld [vmem:[#allocation7 + $0x88] ss:$16 sps:$4 sm:$0xff]  }
  0x8c   :  { %1121 = vmatpush1.bf16.msra.mxu1 %v1522_v4 }
  0x8d   :  { %629 = vmatpush1.bf16.msra.mxu0 %v1427_v35  ;;  %1122 = vmatprep.subr.bf16.mxu1 %v1523_v5  ;;  %v1456_v35 = vld [vmem:[#allocation7 + $0xac] ss:$16 sps:$4 sm:$0xff]  }
  0x8e   :  { %630 = vmatprep.subr.bf16.mxu0 %v1432_v36  ;;  %v1454_v36 = vld [vmem:[#allocation7 + $0xa8] ss:$16 sps:$4 sm:$0xff]  }
  0x90   :  { %1123 = vmatpush1.bf16.msra.mxu1 %v1525_v7 }
  0x91   :  { %631 = vmatpush1.bf16.msra.mxu0 %v1430_v37  ;;  %1124 = vmatprep.subr.bf16.mxu1 %v1526_v10  ;;  %v1459_v37 = vld [vmem:[#allocation7 + $0xcc] ss:$16 sps:$4 sm:$0xff]  }
  0x92   :  { %632 = vmatprep.subr.bf16.mxu0 %v1435_v38  ;;  %v1457_v38 = vld [vmem:[#allocation7 + $0xc8] ss:$16 sps:$4 sm:$0xff]  }
  0x94   :  { %1125 = vmatpush1.bf16.msra.mxu1 %v1528_v12 }
  0x95   :  { %633 = vmatpush1.bf16.msra.mxu0 %v1433_v39  ;;  %v1462_v39 = vld [vmem:[#allocation7 + $0xec] ss:$16 sps:$4 sm:$0xff]   ;;  %1126 = vmatprep.subr.bf16.mxu1 %v1529_v57 }
  0x96   :  { %634 = vmatprep.subr.bf16.mxu0 %v1438_v40  ;;  %v1460_v40 = vld [vmem:[#allocation7 + $0xe8] ss:$16 sps:$4 sm:$0xff]  }
  0x98   :  { %1127 = vmatpush1.bf16.msra.mxu1 %v1531_v58 }
  0x99   :  { %635 = vmatpush1.bf16.msra.mxu0 %v1436_v41  ;;  %v1465_v41 = vld [vmem:[#allocation7 + $0x10c] ss:$16 sps:$4 sm:$0xff]   ;;  %1128 = vmatprep.subr.bf16.mxu1 %v1532_v59 }
  0x9a   :  { %645 = vmatprep.subr.bf16.mxu0 %v1441_v42  ;;  %v1463_v42 = vld [vmem:[#allocation7 + $0x108] ss:$16 sps:$4 sm:$0xff]  }
  0x9c   :  { %1129 = vmatpush1.bf16.msra.mxu1 %v1534_v60 }
  0x9d   :  { %1139 = vmatprep.subr.bf16.mxu1 %v1537_v61 }
 0x12f   :  { %v183_v14 = vpop.f32.mrb[0].mxu0 }
 0x130   :  { %v184_v15 = vadd.f32 %v183_v14, %v98_v11  ;;  %v185_v16 = vpop.f32.mrb[1].mxu0 }
 0x131   :  { %v186_v17 = vadd.f32 %v185_v16, %v102_v13  ;;  %v187_v18 = vpop.f32.mrb[2].mxu0 }
 0x132   :  { %vm190_vm1 = vcmp.gt.f32.partialorder %v184_v15, 0.0  ;;  %v192_v19 = vmul.f32 0.01, %v184_v15  ;;  %v188_v20 = vpop.f32.mrb[3].mxu0  ;;  %v1538_v18 = vld [vmem:[#allocation8 + $0x110] ss:$8 sps:$4 sm:$0xff]  }
 0x133   :  { %vm191_vm2 = vcmp.gt.f32.partialorder %v186_v17, 0.0  ;;  %v193_v21 = vmul.f32 0.01, %v186_v17  ;;  %v1541_v20 = vld [vmem:[#allocation8 + $0x120] ss:$8 sps:$4 sm:$0xff]  }
 0x134   :  { %v194_v22 = vsel %vm190_vm1, %v184_v15, %v192_v19  ;;  %v1535_v15 = vld [vmem:[#allocation8 + $0x100] ss:$8 sps:$4 sm:$0xff]   ;;  %v1543_v19 = vld [vmem:[#allocation8 + $0x124] ss:$8 sps:$4 sm:$0xff]  }
 0x135   :  { %v195_v23 = vsel %vm191_vm2, %v186_v17, %v193_v21  ;;  %v1850_v26 = vpack.c.bf16 %v194_v22, %v194_v22  ;;  %v1540_v17 = vld [vmem:[#allocation8 + $0x114] ss:$8 sps:$4 sm:$0xff]   ;;  %v1544_v22 = vld [vmem:[#allocation8 + $0x130] ss:$8 sps:$4 sm:$0xff]  }
 0x136   :  { %v197_v24 = vpack.c.bf16 %v195_v23, %v195_v23  ;;  %v1546_v21 = vld [vmem:[#allocation8 + $0x134] ss:$8 sps:$4 sm:$0xff]   ;;  %v1549_v23 = vld [vmem:[#allocation8 + $0x144] ss:$8 sps:$4 sm:$0xff]  }
 0x138   :  { %636 = vmatprep.mubr.bf16.mxu0 %v197_v24 }
 0x139   :  { %637 = vmatmul.mubr.bf16.vlgmr.msra.gmra.mrb[4].mxu0 %v1850_v26 }
 0x13a   :  { %646 = vmatpush1.bf16.msra.mxu0 %v1439_v25  ;;  %677 = vmatprep.mubr.bf16.mxu0 %v197_v24  ;;  %v1547_v24 = vld [vmem:[#allocation8 + $0x140] ss:$8 sps:$4 sm:$0xff]   ;;  %v1552_v25 = vld [vmem:[#allocation8 + $0x154] ss:$8 sps:$4 sm:$0xff]  }
 0x13b   :  { %647 = vmatprep.subr.bf16.mxu0 %v1444_v27  ;;  %v1555_v27 = vld [vmem:[#allocation8 + $0x164] ss:$8 sps:$4 sm:$0xff]  }
 0x13e   :  { %648 = vmatpush1.bf16.msra.mxu0 %v1442_v28  ;;  %v1553_v28 = vld [vmem:[#allocation8 + $0x160] ss:$8 sps:$4 sm:$0xff]  }
 0x13f   :  { %649 = vmatprep.subr.bf16.mxu0 %v1447_v29  ;;  %v1558_v29 = vld [vmem:[#allocation8 + $0x174] ss:$8 sps:$4 sm:$0xff]  }
 0x142   :  { %650 = vmatpush1.bf16.msra.mxu0 %v1445_v30  ;;  %v1556_v30 = vld [vmem:[#allocation8 + $0x170] ss:$8 sps:$4 sm:$0xff]  }
 0x143   :  { %651 = vmatprep.subr.bf16.mxu0 %v1450_v31  ;;  %v1561_v31 = vld [vmem:[#allocation8 + $0x184] ss:$8 sps:$4 sm:$0xff]  }
 0x146   :  { %652 = vmatpush1.bf16.msra.mxu0 %v1448_v32  ;;  %v1559_v32 = vld [vmem:[#allocation8 + $0x180] ss:$8 sps:$4 sm:$0xff]  }
 0x147   :  { %653 = vmatprep.subr.bf16.mxu0 %v1453_v33  ;;  %v1564_v33 = vld [vmem:[#allocation8 + $0x194] ss:$8 sps:$4 sm:$0xff]  }
 0x14a   :  { %654 = vmatpush1.bf16.msra.mxu0 %v1451_v34  ;;  %v1562_v34 = vld [vmem:[#allocation8 + $0x190] ss:$8 sps:$4 sm:$0xff]  }
 0x14b   :  { %655 = vmatprep.subr.bf16.mxu0 %v1456_v35  ;;  %v1567_v35 = vld [vmem:[#allocation8 + $0x1a4] ss:$8 sps:$4 sm:$0xff]  }
 0x14e   :  { %656 = vmatpush1.bf16.msra.mxu0 %v1454_v36  ;;  %v1565_v36 = vld [vmem:[#allocation8 + $0x1a0] ss:$8 sps:$4 sm:$0xff]  }
 0x14f   :  { %657 = vmatprep.subr.bf16.mxu0 %v1459_v37  ;;  %v1570_v37 = vld [vmem:[#allocation8 + $0x1b4] ss:$8 sps:$4 sm:$0xff]  }
 0x152   :  { %658 = vmatpush1.bf16.msra.mxu0 %v1457_v38  ;;  %v1568_v38 = vld [vmem:[#allocation8 + $0x1b0] ss:$8 sps:$4 sm:$0xff]  }
 0x153   :  { %659 = vmatprep.subr.bf16.mxu0 %v1462_v39  ;;  %v1573_v39 = vld [vmem:[#allocation8 + $0x1c4] ss:$8 sps:$4 sm:$0xff]  }
 0x156   :  { %660 = vmatpush1.bf16.msra.mxu0 %v1460_v40  ;;  %v1571_v40 = vld [vmem:[#allocation8 + $0x1c0] ss:$8 sps:$4 sm:$0xff]  }
 0x157   :  { %661 = vmatprep.subr.bf16.mxu0 %v1465_v41  ;;  %v1576_v41 = vld [vmem:[#allocation8 + $0x1d4] ss:$8 sps:$4 sm:$0xff]  }
 0x15a   :  { %662 = vmatpush1.bf16.msra.mxu0 %v1463_v42  ;;  %v274_v42 = vsub.s32 2, %v1837_v3 }
 0x15b   :  { %663 = vmatprep.subr.bf16.mxu0 %v1468_v43  ;;  %v278_v43 = vsub.s32 3, %v1837_v3 }
 0x15e   :  { %664 = vmatpush1.bf16.msra.mxu0 %v1466_v44  ;;  %v1574_v44 = vld [vmem:[#allocation8 + $0x1d0] ss:$8 sps:$4 sm:$0xff]  }
 0x15f   :  { %665 = vmatprep.subr.bf16.mxu0 %v1471_v45  ;;  %v1579_v45 = vld [vmem:[#allocation8 + $0x1e4] ss:$8 sps:$4 sm:$0xff]  }
 0x162   :  { %666 = vmatpush1.bf16.msra.mxu0 %v1469_v46  ;;  %v275_v46 = vrot.slane %v1857_v62, %v274_v42 }
 0x163   :  { %667 = vmatprep.subr.bf16.mxu0 %v1474_v47  ;;  %v279_v47 = vrot.slane %v1857_v62, %v278_v43  ;;  %v766_v62 = vld [vmem:[%s1902_s6] sm:$0x3]  ;;  %s1673_s6 = scalar_lea.vmem %s1211_s13, 256 }
 0x164   :  { %p1674_p4 = scmp.ne.s32.totalorder %s1211_s13, %s1673_s6  ;;  %p1679_p6 = scmp.lt.s32.totalorder %s1673_s6, %s1673_s6 }
 0x166   :  { %668 = vmatpush1.bf16.msra.mxu0 %v1472_v48  ;;  %v1577_v48 = vld [vmem:[#allocation8 + $0x1e0] ss:$8 sps:$4 sm:$0xff]   ;;  %p1680_p7 = por %p1679_p6, %p1678_p5 }
 0x167   :  { %669 = vmatprep.subr.bf16.mxu0 %v1477_v49 }
 0x168   :  { %p1681_p8 = pnand %p1680_p7, %p1674_p4 }
 0x16a   :  { %670 = vmatpush1.bf16.msra.mxu0 %v1475_v50  ;;  %v1582_v50 = vld [vmem:[#allocation8 + $0x1f4] ss:$8 sps:$4 sm:$0xff]  }
 0x16b   :  { %671 = vmatprep.subr.bf16.mxu0 %v1480_v51 }
 0x16e   :  { %672 = vmatpush1.bf16.msra.mxu0 %v1478_v52 }
 0x16f   :  { %673 = vmatprep.subr.bf16.mxu0 %v1483_v53 }
 0x172   :  { %674 = vmatpush1.bf16.msra.mxu0 %v1481_v54 }
 0x173   :  { %675 = vmatprep.subr.bf16.mxu0 %v1486_v55 }
 0x176   :  { %676 = vmatpush1.bf16.msra.mxu0 %v1484_v56  ;;  %v1580_v56 = vld [vmem:[#allocation8 + $0x1f0] ss:$8 sps:$4 sm:$0xff]  }
 0x179   :  { %678 = vmatmul.mubr.bf16.vlgmr.msra.gmra.mrb[8].mxu0 %v1850_v26  ;;  %v1550_v26 = vld [vmem:[#allocation8 + $0x150] ss:$8 sps:$4 sm:$0xff]  }
 0x20c   :  { %v638_v1 = vpop.f32.mrb[4].mxu0 }
 0x20d   :  { %v639_v2 = vadd.f32 %v638_v1, %v267_v63  ;;  %v640_v4 = vpop.f32.mrb[5].mxu0  ;;  %v771_v63 = vrot.slane %v766_v62, %v1840_v6 }
 0x20e   :  { %v641_v5 = vadd.f32 %v640_v4, %v271_v0  ;;  %v642_v7 = vpop.f32.mrb[6].mxu0  ;;  %v775_v0 = vrot.slane %v766_v62, %v1846_v9 }
 0x20f   :  { %vm686_vm3 = vcmp.gt.f32.partialorder %v639_v2, 0.0  ;;  %v690_v8 = vmul.f32 0.01, %v639_v2  ;;  %v643_v10 = vpop.f32.mrb[7].mxu0 }
 0x210   :  { %vm687_vm4 = vcmp.gt.f32.partialorder %v641_v5, 0.0  ;;  %v691_v11 = vmul.f32 0.01, %v641_v5 }
 0x211   :  { %v694_v12 = vsel %vm686_vm3, %v639_v2, %v690_v8 }
 0x212   :  { %v695_v13 = vsel %vm687_vm4, %v641_v5, %v691_v11  ;;  %v698_v16 = vpack.c.bf16 %v694_v12, %v694_v12 }
 0x213   :  { %v699_v14 = vpack.c.bf16 %v695_v13, %v695_v13 }
 0x215   :  { %1130 = vmatprep.mubr.bf16.mxu1 %v699_v14 }
 0x216   :  { %1131 = vmatmul.mubr.bf16.vlgmr.msra.gmra.mrb[0].mxu1 %v698_v16 }
 0x217   :  { %1140 = vmatpush1.bf16.msra.mxu1 %v1535_v15 }
 0x218   :  { %1141 = vmatprep.subr.bf16.mxu1 %v1540_v17 }
 0x21b   :  { %1142 = vmatpush1.bf16.msra.mxu1 %v1538_v18 }
 0x21c   :  { %1143 = vmatprep.subr.bf16.mxu1 %v1543_v19 }
 0x21f   :  { %1144 = vmatpush1.bf16.msra.mxu1 %v1541_v20 }
 0x220   :  { %1145 = vmatprep.subr.bf16.mxu1 %v1546_v21 }
 0x223   :  { %1146 = vmatpush1.bf16.msra.mxu1 %v1544_v22 }
 0x224   :  { %1147 = vmatprep.subr.bf16.mxu1 %v1549_v23 }
 0x227   :  { %1148 = vmatpush1.bf16.msra.mxu1 %v1547_v24 }
 0x228   :  { %1149 = vmatprep.subr.bf16.mxu1 %v1552_v25 }
 0x22b   :  { %1150 = vmatpush1.bf16.msra.mxu1 %v1550_v26 }
 0x22c   :  { %1151 = vmatprep.subr.bf16.mxu1 %v1555_v27 }
 0x22f   :  { %1152 = vmatpush1.bf16.msra.mxu1 %v1553_v28 }
 0x230   :  { %1153 = vmatprep.subr.bf16.mxu1 %v1558_v29 }
 0x233   :  { %1154 = vmatpush1.bf16.msra.mxu1 %v1556_v30 }
 0x234   :  { %1155 = vmatprep.subr.bf16.mxu1 %v1561_v31 }
 0x237   :  { %1156 = vmatpush1.bf16.msra.mxu1 %v1559_v32 }
 0x238   :  { %1157 = vmatprep.subr.bf16.mxu1 %v1564_v33 }
 0x23b   :  { %1158 = vmatpush1.bf16.msra.mxu1 %v1562_v34 }
 0x23c   :  { %1159 = vmatprep.subr.bf16.mxu1 %v1567_v35 }
 0x23f   :  { %1160 = vmatpush1.bf16.msra.mxu1 %v1565_v36 }
 0x240   :  { %1161 = vmatprep.subr.bf16.mxu1 %v1570_v37 }
 0x243   :  { %1162 = vmatpush1.bf16.msra.mxu1 %v1568_v38 }
 0x244   :  { %1163 = vmatprep.subr.bf16.mxu1 %v1573_v39 }
 0x247   :  { %1164 = vmatpush1.bf16.msra.mxu1 %v1571_v40 }
 0x248   :  { %1165 = vmatprep.subr.bf16.mxu1 %v1576_v41 }
 0x24b   :  { %1166 = vmatpush1.bf16.msra.mxu1 %v1574_v44 }
 0x24c   :  { %v679_v49 = vpop.f32.mrb[8].mxu0  ;;  %1167 = vmatprep.subr.bf16.mxu1 %v1579_v45 }
 0x24d   :  { %v680_v51 = vadd.f32 %v679_v49, %v275_v46  ;;  %v681_v52 = vpop.f32.mrb[9].mxu0 }
 0x24e   :  { %v682_v53 = vadd.f32 %v681_v52, %v279_v47  ;;  %v683_v54 = vpop.f32.mrb[10].mxu0 }
 0x24f   :  { %vm688_vm5 = vcmp.gt.f32.partialorder %v680_v51, 0.0  ;;  %v692_v55 = vmul.f32 0.01, %v680_v51  ;;  %v684_v3 = vpop.f32.mrb[11].mxu0  ;;  %1168 = vmatpush1.bf16.msra.mxu1 %v1577_v48 }
 0x250   :  { %vm689_vm6 = vcmp.gt.f32.partialorder %v682_v53, 0.0  ;;  %v693_v57 = vmul.f32 0.01, %v682_v53  ;;  %1169 = vmatprep.subr.bf16.mxu1 %v1582_v50 }
 0x251   :  { %v696_v58 = vsel %vm688_vm5, %v680_v51, %v692_v55 }
 0x252   :  { %v697_v59 = vsel %vm689_vm6, %v682_v53, %v693_v57  ;;  %v700_v61 = vpack.c.bf16 %v696_v58, %v696_v58 }
 0x253   :  { %1170 = vmatpush1.bf16.msra.mxu1 %v1580_v56  ;;  %v701_v60 = vpack.c.bf16 %v697_v59, %v697_v59 }
 0x255   :  { %1171 = vmatprep.mubr.bf16.mxu1 %v701_v60 }
 0x256   :  { %1172 = vmatmul.mubr.bf16.vlgmr.msra.gmra.mrb[0].mxu1 %v700_v61 }
 0x329   :  { %v1173_v1 = vpop.f32.mrb[0].mxu1 }
 0x32a   :  { %v1362_v2 = vadd.f32 %v1173_v1, %v771_v63  ;;  %v1175_v4 = vpop.f32.mrb[1].mxu1 }
 0x32b   :  { %v1363_v5 = vadd.f32 %v1175_v4, %v775_v0  ;;  %v1177_v7 = vpop.f32.mrb[2].mxu1 }
 0x32c   :  { %1190 = vst [vmem:[#allocation11] sm:$0xff] %v1362_v2  ;;  %v1178_v8 = vpop.f32.mrb[3].mxu1  ;;  %v1180_v10 = vmul.f32 %v1362_v2, %v1362_v2 }
 0x32d   :  { %1191 = vst [vmem:[#allocation11 + $0x8] sm:$0xff] %v1363_v5  ;;  %v1181_v11 = vmul.f32 %v1363_v5, %v1363_v5 }
 0x32f   :  { %v1182_v12 = vadd.f32 %v1181_v11, %v1180_v10 }
 0x331   :  { %1183 = vadd.xlane.f32.xlu0 %v1182_v12 }
 0x332   :  { %1684 = shalt.err (!%p1681_p8)
}
 0x333   :  { %s1685_s18 = scalar_lea.hbm %s1904_s8, 256 }
 0x334   :  { %p1686_p9 = scmp.ne.s32.totalorder %s1904_s8, %s1685_s18  ;;  %p1689_p10 = scmp.lt.u32.totalorder %s1685_s18, %s1904_s8 }
 0x336   :  { %p1691_p11 = pnand %p1689_p10, %p1686_p9 }
 0x338   :  { %1694 = shalt.err (!%p1691_p11)
}
 0x339   :  { %1213 = dma.vmem_to_hbm [thread:$0]  %s1211_s13, 256, %s1904_s8, [#allocation12]  }
 0x33a   :  { %s1737_s25 = smov [#allocation10]  }
 0x33b   :  { %s1200_s26 = sshll.u32 %s1737_s25, 4  ;;  %s1201_s26 = int_to_ptr.vmem [resolvable:$true] %s1200_s26 }
 0x33c   :  { %s1695_s27 = scalar_lea.vmem %s1201_s26, 256  ;;  %p1700_p13 = scmp.lt.s32.totalorder %s1201_s26, %s1201_s26 }
 0x33d   :  { %p1696_p12 = scmp.ne.s32.totalorder %s1201_s26, %s1695_s27  ;;  %p1701_p0 = scmp.lt.s32.totalorder %s1695_s27, %s1695_s27 }
 0x33f   :  { %p1702_p1 = por %p1701_p0, %p1700_p13 }
 0x341   :  { %p1703_p2 = pnand %p1702_p1, %p1696_p12 }
 0x3be   :  { %v1184_v6 = vpop.xlane.xlu0 %1183 }
 0x3bf   :  { %1583 = vrsqrt.f32 %v1184_v6  ;;  %vm1185_vm7 = vcmp.gt.f32.partialorder %v1184_v6, 0.0 }
 0x3c9   :  { %v1584_v9 = vpop.eup %1583 }
 0x3ca   :  { %v1187_v13 = vsel %vm1185_vm7, %v1584_v9, 0.0 }
 0x3cb   :  { %v1188_v14 = vmul.f32 %v1362_v2, %v1187_v13  ;;  %v1189_v15 = vmul.f32 %v1363_v5, %v1187_v13 }
 0x3cd   :  { %1192 = vst [vmem:[#allocation10] sm:$0xff] %v1188_v14  ;;  %1193 = vst [vmem:[#allocation10 + $0x8] sm:$0xff] %v1189_v15 }
 0x3ce   :  { %1706 = shalt.err (!%p1703_p2)
}
 0x3cf   :  { %s1707_s30 = scalar_lea.hbm %s1903_s7, 256 }
 0x3d0   :  { %p1708_p3 = scmp.ne.s32.totalorder %s1903_s7, %s1707_s30  ;;  %p1711_p4 = scmp.lt.u32.totalorder %s1707_s30, %s1903_s7 }
 0x3d2   :  { %p1713_p5 = pnand %p1711_p4, %p1708_p3 }
 0x3d4   :  { %1716 = shalt.err (!%p1713_p5)
}
 0x3d5   :  { %1203 = dma.vmem_to_hbm [thread:$0]  %s1201_s26, 256, %s1903_s7, [#allocation4]  }
 0x3d6   :  { %1723 = dma.done.wait [#allocation4], 256  }
 0x3d7   :  { %1724 = vsyncadd [#allocation4], 4294967040 }
 0x3d8   :  { %1725 = dma.done.wait [#allocation12], 256  }
 0x3d9   :  { %1726 = vsyncadd [#allocation12], 4294967040 }
 0x3da   :  { %1220 = vsyncpa [#allocation3], 1 }
 0x3db   :  { %1221 = vsyncpa [#allocation6], 1 }
 0x3dc   :  { %1222 = vsyncpa [#allocation9], 1 }
 0x3dd   :  { %1223 = vsyncpa [#allocation4], 1 }
 0x3de   :  { %1224 = vsyncpa [#allocation12], 1 }

</bundles_post_ra>
